<compile_context>
chip_gen: v7x
topology: tpu7x:2x2x1
jax: 0.10.0
libtpu: 0.0.40
codegen_flags: <defaults>
</compile_context>

<pallas_src>
import functools

import jax
import jax.numpy as jnp
from jax.experimental import pallas as pl
from jax.experimental.pallas import tpu as pltpu

C_PAD = 128                      # lane-dense channel padding
VMEM_LIMIT = 32 * 1024 * 1024    # == v7x scoped default; safe on v5e/v6e too


def _num_tensorcores() -> int:
    """Best-effort TensorCore-per-chip count (v7x=2, v5e/v6e=1)."""
    try:
        info = pltpu.get_tpu_info()
        for attr in ("num_cores", "core_count", "num_tensorcores"):
            v = getattr(info, attr, None)
            if isinstance(v, int) and v > 0:
                return v
    except Exception:
        pass
    try:
        d = jax.devices()[0]
        for attr in ("num_cores", "core_count"):
            v = getattr(d, attr, None)
            if isinstance(v, int) and v > 0:
                return v
    except Exception:
        pass
    # Conservative default: assume dual-TC (v7x).  On 1-TC chips the extra
    # grid step costs ~0.35us, negligible at these sizes.
    return 2


def _pick_tile_m(m: int, k: int, ncores: int) -> int:
    """Largest M tile that fits the VMEM budget; >=2 tiles on dual-TC chips."""
    def fits(c):
        # double-buffered: pat (bf16) + y (bf16) + stats (f32) per step
        return 2 * c * (2 * k + 2 * C_PAD) + 2 * 8 * C_PAD * 4 <= VMEM_LIMIT // 2

    if ncores >= 2:
        for c in (1024, 512, 256, 128, 64):
            if m % c == 0 and m // c >= 2 and fits(c):
                return c
    for c in (2048, 1024, 512, 256, 128, 64, 32, 16, 8):
        if m % c == 0 and fits(c):
            return c
    return m


def _pick_tile_p(p: int) -> int:
    for c in (512, 256, 128, 64, 32, 16, 8):
        if p % c == 0:
            return c
    return p


# ---------------- kernel 1: conv (matmul) + per-tile partial BN stats --------
def _conv_stats_kernel(p_ref, w_ref, y_ref, st_ref):
    # p_ref: (TILE_M, K) bf16   w_ref: (K, 128) bf16
    # y_ref: (TILE_M, 128) bf16 st_ref: (8, 128) f32
    y = jnp.dot(p_ref[...], w_ref[...], preferred_element_type=jnp.float32)
    y_ref[...] = y.astype(y_ref.dtype)                      # bf16 writeback
    s0 = jnp.sum(y, axis=0, keepdims=True)                  # per-channel sum (f32)
    s1 = jnp.sum(y * y, axis=0, keepdims=True)              # per-channel sumsq (f32)
    # build the (8,128) stats block in registers, store once (single vst)
    row = jax.lax.broadcasted_iota(jnp.int32, st_ref.shape, 0)
    st_ref[...] = jnp.where(row == 0, jnp.broadcast_to(s0, st_ref.shape),
                            jnp.where(row == 1, jnp.broadcast_to(s1, st_ref.shape),
                                      0.0))


# -------- kernel 2: BN finalize + affine + ReLU + 2x2 max-pool (fused) -------
def _bn_relu_pool_kernel(y4_ref, st_ref, gb_ref, o_ref, *, n_tiles, inv_count, eps):
    # y4_ref: (4, TILE_P, 128) bf16 -- the 4 (dh, dw) slabs of one image's P-tile
    # st_ref: (n_tiles*8, 128) f32  -- raw per-tile partial stats
    # gb_ref: (8, 128) f32          -- row 0 = gamma (padded), row 1 = beta (padded)
    part = st_ref[...].reshape(n_tiles, 8, C_PAD)
    tot = jnp.sum(part, axis=0)                             # (8, 128)
    mean = tot[0:1, :] * inv_count
    var = jnp.maximum(tot[1:2, :] * inv_count - mean * mean, 0.0)
    inv = jax.lax.rsqrt(var + eps)
    scale2 = gb_ref[0:1, :] * inv                           # gamma / sqrt(var+eps)
    shift2 = gb_ref[1:2, :] - mean * scale2                 # beta - mean*scale
    scale = scale2.reshape(1, 1, C_PAD)
    shift = shift2.reshape(1, 1, C_PAD)

    z = y4_ref[...].astype(jnp.float32)                     # upcast bf16 -> f32
    zr = jnp.maximum(z * scale + shift, 0.0)
    o_ref[...] = jnp.max(zr, axis=0).astype(o_ref.dtype)    # element-wise max over 4 slabs


# ---------------- host-side glue: im2col in pooling-friendly row order -------
def _build_patches_pool_order(x_nhwc):
    """patches[((n*2+dh)*2+dw)*Ho*Wo + ho*Wo + wo, (kh*3+kw)*Cin + ci]
       = x_pad[n, 2*ho+dh+kh, 2*wo+dw+kw, ci]"""
    N, H, W, Cin = x_nhwc.shape
    Ho, Wo = H // 2, W // 2
    xp = jnp.pad(x_nhwc, ((0, 0), (1, 1), (1, 1), (0, 0)))
    cols = []
    for kh in range(3):
        for kw in range(3):
            cols.append(xp[:, kh:kh + H, kw:kw + W, :])      # (N,H,W,Cin)
    pat = jnp.stack(cols, axis=3)                            # (N,H,W,9,Cin)
    pat = pat.reshape(N, Ho, 2, Wo, 2, 9, Cin)
    pat = pat.transpose(0, 2, 4, 1, 3, 5, 6)                 # (N,2,2,Ho,Wo,9,Cin)
    return pat.reshape(N * 4 * Ho * Wo, 9 * Cin)


# ---------------- one layer: conv3x3(SAME) + BN(train) + ReLU + MaxPool(2,2) -
def conv_bn_relu_pool(x_nhwc, w_oihw, gamma, beta, *, eps=1e-5,
                      out_dtype=jnp.bfloat16, ncores=2):
    N, H, W, Cin = x_nhwc.shape
    Cout = w_oihw.shape[0]
    assert Cout <= C_PAD
    # TODO(synk): odd H/W would need PyTorch MaxPool2d floor semantics.
    assert H % 2 == 0 and W % 2 == 0
    Ho, Wo = H // 2, W // 2
    P = Ho * Wo
    Mtot = N * H * W
    K = Cin * 9

    pat = _build_patches_pool_order(x_nhwc.astype(jnp.bfloat16))      # (Mtot, K) bf16
    # weights (Cout,Cin,3,3) -> (K, Cout) matching patch K-order, padded to 128 lanes
    w2d = jnp.transpose(w_oihw, (2, 3, 1, 0)).reshape(K, Cout).astype(jnp.bfloat16)
    w2d = jnp.pad(w2d, ((0, 0), (0, C_PAD - Cout)))

    tile_m = _pick_tile_m(Mtot, K, ncores)
    n_tiles = Mtot // tile_m

    y, stats = pl.pallas_call(
        _conv_stats_kernel,
        out_shape=(jax.ShapeDtypeStruct((Mtot, C_PAD), jnp.bfloat16),
                   jax.ShapeDtypeStruct((n_tiles * 8, C_PAD), jnp.float32)),
        grid=(n_tiles,),
        in_specs=[
            pl.BlockSpec((tile_m, K), lambda i: (i, 0)),
            pl.BlockSpec((K, C_PAD), lambda i: (0, 0)),
        ],
        out_specs=[
            pl.BlockSpec((tile_m, C_PAD), lambda i: (i, 0)),
            pl.BlockSpec((8, C_PAD), lambda i: (i, 0)),
        ],
        compiler_params=pltpu.CompilerParams(
            dimension_semantics=("parallel",),
            vmem_limit_bytes=VMEM_LIMIT),
    )(pat, w2d)

    # gamma/beta packed into one (8,128) block; depends only on params, so XLA
    # can schedule it concurrently with kernel 1 (nothing sits between the two
    # pallas_calls on the y/stats data path).
    gb = jnp.zeros((8, C_PAD), jnp.float32)
    gb = gb.at[0, :Cout].set(gamma.astype(jnp.float32))
    gb = gb.at[1, :Cout].set(beta.astype(jnp.float32))

    tile_p = _pick_tile_p(P)
    n_ptiles = P // tile_p
    y4 = y.reshape(N * 4, P, C_PAD)          # pure metadata reshape, no transpose

    pool_kernel = functools.partial(
        _bn_relu_pool_kernel,
        n_tiles=n_tiles, inv_count=float(1.0 / Mtot), eps=float(eps))

    pooled = pl.pallas_call(
        pool_kernel,
        out_shape=jax.ShapeDtypeStruct((N, P, C_PAD), out_dtype),
        grid=(N, n_ptiles),
        in_specs=[
            pl.BlockSpec((4, tile_p, C_PAD), lambda n, p: (n, p, 0)),
            pl.BlockSpec((n_tiles * 8, C_PAD), lambda n, p: (0, 0)),
            pl.BlockSpec((8, C_PAD), lambda n, p: (0, 0)),
        ],
        out_specs=pl.BlockSpec((None, tile_p, C_PAD), lambda n, p: (n, p, 0)),
        compiler_params=pltpu.CompilerParams(
            dimension_semantics=("parallel", "parallel"),
            vmem_limit_bytes=VMEM_LIMIT),
    )(y4, stats, gb)

    pooled = pooled.reshape(N, Ho, Wo, C_PAD)
    return pooled[..., :Cout]                 # drop the zero lane-padding


# ------------------------------ full forward ---------------------------------
def cnn_encoder_forward(x_nchw, params):
    N = x_nchw.shape[0]
    ncores = _num_tensorcores()
    x = jnp.transpose(x_nchw, (0, 2, 3, 1))                    # NCHW -> NHWC
    # conv bias omitted on purpose: training-mode BN subtracts the batch mean,
    # so a per-channel bias before BN is mathematically a no-op.
    h1 = conv_bn_relu_pool(x, params["w1"], params["g1"], params["bt1"],
                           out_dtype=jnp.bfloat16, ncores=ncores)
    h2 = conv_bn_relu_pool(h1, params["w2"], params["g2"], params["bt2"],
                           out_dtype=jnp.float32, ncores=ncores)
    # PyTorch flattens NCHW: (N, C, H, W) -> (N, C*H*W)
    return jnp.transpose(h2, (0, 3, 1, 2)).reshape(N, -1)


# ------------------------------ pure-JAX reference ---------------------------
def reference_forward(x, params):
    def conv(x, w, b):
        y = jax.lax.conv_general_dilated(
            x, w, (1, 1), "SAME", dimension_numbers=("NCHW", "OIHW", "NCHW"))
        return y + b.reshape(1, -1, 1, 1)

    def bn_relu_pool(y, g, bt):
        mean = jnp.mean(y, axis=(0, 2, 3), keepdims=True)
        var = jnp.mean((y - mean) ** 2, axis=(0, 2, 3), keepdims=True)
        z = (y - mean) * jax.lax.rsqrt(var + 1e-5) * g.reshape(1, -1, 1, 1) \
            + bt.reshape(1, -1, 1, 1)
        z = jnp.maximum(z, 0.0)
        N, C, H, W = z.shape
        return jnp.max(z.reshape(N, C, H // 2, 2, W // 2, 2), axis=(3, 5))

    h = bn_relu_pool(conv(x, params["w1"], params["b1"]), params["g1"], params["bt1"])
    h = bn_relu_pool(conv(h, params["w2"], params["b2"]), params["g2"], params["bt2"])
    return h.reshape(h.shape[0], -1)


if __name__ == "__main__":
    key = jax.random.PRNGKey(0)
    k_x, k_w1, k_b1, k_w2, k_b2 = jax.random.split(key, 5)

    # deterministic synthetic parameters (shapes from the PyTorch module)
    params = {
        "w1": jax.random.normal(k_w1, (32, 1, 3, 3), jnp.float32) * 0.2,
        "b1": jax.random.normal(k_b1, (32,), jnp.float32) * 0.1,
        "g1": jnp.ones((32,), jnp.float32),
        "bt1": jnp.zeros((32,), jnp.float32),
        "w2": jax.random.normal(k_w2, (64, 32, 3, 3), jnp.float32) * 0.05,
        "b2": jax.random.normal(k_b2, (64,), jnp.float32) * 0.1,
        "g2": jnp.ones((64,), jnp.float32),
        "bt2": jnp.zeros((64,), jnp.float32),
    }

    x = jax.random.normal(k_x, (2, 1, 16, 16), jnp.float32)    # NCHW, 1 input channel

    out = jax.jit(cnn_encoder_forward)(x, params)
    out = jax.block_until_ready(out)
    assert out.shape == (2, 64 * 4 * 4), out.shape

    ref = jax.block_until_ready(jax.jit(reference_forward)(x, params))
    # bf16 matmul inputs + bf16 intermediates across two conv+BN layers:
    # expected max |diff| vs the f32 reference is a few 1e-2 after BN rescaling,
    # while any structural bug produces O(1) errors -- 5e-2 separates the two.
    if not jnp.allclose(out, ref, rtol=5e-2, atol=5e-2):
        max_diff = float(jnp.max(jnp.abs(out - ref)))
        raise AssertionError(f"mismatch vs reference, max |diff| = {max_diff}")

    print("KERNEL_OK")
</pallas_src>

<mosaic_0001>
module attributes {stable_mosaic.version = 11 : i64} {
  func.func @_conv_stats_kernel(%arg0: i32, %arg1: memref<256x9xbf16, #tpu.memory_space<vmem>>, %arg2: memref<9x128xbf16, #tpu.memory_space<vmem>>, %arg3: memref<256x128xbf16, #tpu.memory_space<vmem>>, %arg4: memref<8x128xf32, #tpu.memory_space<vmem>>) attributes {dimension_semantics = [#tpu.dimension_semantics<parallel>], iteration_bounds = array<i64: 2>, scalar_prefetch = 0 : i64, scratch_operands = 0 : i64, tpu.core_type = #tpu.core_type<tc>, window_params = [{transform_indices = @transform_0, window_bounds = array<i64: 256, 9>}, {pipeline_mode = #tpu.pipeline_mode<synchronous>, transform_indices = @transform_1, window_bounds = array<i64: 9, 128>}, {transform_indices = @transform_2, window_bounds = array<i64: 256, 128>}, {transform_indices = @transform_3, window_bounds = array<i64: 8, 128>}]} {
    %c0 = arith.constant 0 : index
    %c0_0 = arith.constant 0 : index
    %0 = vector.load %arg1[%c0, %c0_0] : memref<256x9xbf16, #tpu.memory_space<vmem>>, vector<256x9xbf16>
    %c0_1 = arith.constant 0 : index
    %c0_2 = arith.constant 0 : index
    %1 = vector.load %arg2[%c0_1, %c0_2] : memref<9x128xbf16, #tpu.memory_space<vmem>>, vector<9x128xbf16>
    %cst = arith.constant dense<0.000000e+00> : vector<256x128xf32>
    %2 = tpu.matmul %0, %1, %cst {dimension_numbers = #tpu.dot_dimension_numbers<[1], [0], [0], [1], [0, 0, 1, 1], [], []>} : vector<256x9xbf16>, vector<9x128xbf16>, vector<256x128xf32> -> vector<256x128xf32>
    %3 = arith.truncf %2 : vector<256x128xf32> to vector<256x128xbf16>
    %c0_3 = arith.constant 0 : index
    %c0_4 = arith.constant 0 : index
    %4 = vector.load %arg3[%c0_3, %c0_4] : memref<256x128xbf16, #tpu.memory_space<vmem>>, vector<256x128xbf16>
    tpu.vector_store %arg3[%c0_3, %c0_4], %3 {strides = array<i32>} : memref<256x128xbf16, #tpu.memory_space<vmem>>, vector<256x128xbf16>,
    %cst_5 = arith.constant dense<0.000000e+00> : vector<128xf32>
    %5 = vector.multi_reduction <add>, %2, %cst_5 [0] : vector<256x128xf32> to vector<128xf32>
    %6 = vector.shape_cast %5 : vector<128xf32> to vector<1x128xf32>
    %7 = arith.mulf %2, %2 : vector<256x128xf32>
    %cst_6 = arith.constant dense<0.000000e+00> : vector<128xf32>
    %8 = vector.multi_reduction <add>, %7, %cst_6 [0] : vector<256x128xf32> to vector<128xf32>
    %9 = vector.shape_cast %8 : vector<128xf32> to vector<1x128xf32>
    %10 = tpu.iota {dimensions = array<i32: 0>} : vector<8x128xi32>
    %c0_i32 = arith.constant 0 : i32
    %11 = vector.broadcast %c0_i32 : i32 to vector<8x128xi32>
    %12 = arith.cmpi eq, %10, %11 : vector<8x128xi32>
    %13 = vector.shape_cast %6 : vector<1x128xf32> to vector<1x128xf32>
    %14 = vector.broadcast %13 : vector<1x128xf32> to vector<8x128xf32>
    %c1_i32 = arith.constant 1 : i32
    %15 = vector.broadcast %c1_i32 : i32 to vector<8x128xi32>
    %16 = arith.cmpi eq, %10, %15 : vector<8x128xi32>
    %17 = vector.shape_cast %9 : vector<1x128xf32> to vector<1x128xf32>
    %18 = vector.broadcast %17 : vector<1x128xf32> to vector<8x128xf32>
    %cst_7 = arith.constant 0.000000e+00 : f32
    %19 = vector.broadcast %cst_7 : f32 to vector<8x128xf32>
    %20 = arith.select %16, %18, %19 : vector<8x128xi1>, vector<8x128xf32>
    %21 = arith.select %12, %14, %20 : vector<8x128xi1>, vector<8x128xf32>
    %c0_8 = arith.constant 0 : index
    %c0_9 = arith.constant 0 : index
    %22 = vector.load %arg4[%c0_8, %c0_9] : memref<8x128xf32, #tpu.memory_space<vmem>>, vector<8x128xf32>
    tpu.vector_store %arg4[%c0_8, %c0_9], %21 {strides = array<i32>} : memref<8x128xf32, #tpu.memory_space<vmem>>, vector<8x128xf32>,
    return
  }
  func.func @transform_0(%arg0: i32) -> (i32, i32) {
    %c0_i32 = arith.constant 0 : i32
    %c0_i32_0 = arith.constant 0 : i32
    return %arg0, %c0_i32 : i32, i32
  }
  func.func @transform_1(%arg0: i32) -> (i32, i32) {
    %c0_i32 = arith.constant 0 : i32
    %c0_i32_0 = arith.constant 0 : i32
    %c0_i32_1 = arith.constant 0 : i32
    return %c0_i32, %c0_i32_0 : i32, i32
  }
  func.func @transform_2(%arg0: i32) -> (i32, i32) {
    %c0_i32 = arith.constant 0 : i32
    %c0_i32_0 = arith.constant 0 : i32
    return %arg0, %c0_i32 : i32, i32
  }
  func.func @transform_3(%arg0: i32) -> (i32, i32) {
    %c0_i32 = arith.constant 0 : i32
    %c0_i32_0 = arith.constant 0 : i32
    return %arg0, %c0_i32 : i32, i32
  }
}

module attributes {stable_mosaic.version = 11 : i64} {
  func.func @_bn_relu_pool_kernel(%arg0: i32, %arg1: i32, %arg2: memref<4x64x128xbf16, #tpu.memory_space<vmem>>, %arg3: memref<16x128xf32, #tpu.memory_space<vmem>>, %arg4: memref<8x128xf32, #tpu.memory_space<vmem>>, %arg5: memref<1x64x128xbf16, #tpu.memory_space<vmem>>) attributes {dimension_semantics = [#tpu.dimension_semantics<parallel>, #tpu.dimension_semantics<parallel>], iteration_bounds = array<i64: 2, 1>, scalar_prefetch = 0 : i64, scratch_operands = 0 : i64, tpu.core_type = #tpu.core_type<tc>, window_params = [{transform_indices = @transform_0, window_bounds = array<i64: 4, 64, 128>}, {pipeline_mode = #tpu.pipeline_mode<synchronous>, transform_indices = @transform_1, window_bounds = array<i64: 16, 128>}, {pipeline_mode = #tpu.pipeline_mode<synchronous>, transform_indices = @transform_2, window_bounds = array<i64: 8, 128>}, {transform_indices = @transform_3, window_bounds = array<i64: 1, 64, 128>}]} {
    %c0 = arith.constant 0 : index
    %c0_0 = arith.constant 0 : index
    %0 = vector.load %arg3[%c0, %c0_0] : memref<16x128xf32, #tpu.memory_space<vmem>>, vector<16x128xf32>
    %1 = vector.shape_cast %0 : vector<16x128xf32> to vector<2x8x128xf32>
    %cst = arith.constant dense<0.000000e+00> : vector<8x128xf32>
    %2 = vector.multi_reduction <add>, %1, %cst [0] : vector<2x8x128xf32> to vector<8x128xf32>
    %3 = vector.extract_strided_slice %2 {offsets = [0, 0], sizes = [1, 128], strides = [1, 1]} : vector<8x128xf32> to vector<1x128xf32>
    %cst_1 = arith.constant 0.001953125 : f32
    %4 = vector.broadcast %cst_1 : f32 to vector<1x128xf32>
    %5 = arith.mulf %3, %4 : vector<1x128xf32>
    %6 = vector.extract_strided_slice %2 {offsets = [1, 0], sizes = [1, 128], strides = [1, 1]} : vector<8x128xf32> to vector<1x128xf32>
    %cst_2 = arith.constant 0.001953125 : f32
    %7 = vector.broadcast %cst_2 : f32 to vector<1x128xf32>
    %8 = arith.mulf %6, %7 : vector<1x128xf32>
    %9 = arith.mulf %5, %5 : vector<1x128xf32>
    %10 = arith.subf %8, %9 : vector<1x128xf32>
    %cst_3 = arith.constant 0.000000e+00 : f32
    %11 = vector.broadcast %cst_3 : f32 to vector<1x128xf32>
    %12 = arith.maximumf %10, %11 : vector<1x128xf32>
    %cst_4 = arith.constant 9.99999974E-6 : f32
    %13 = vector.broadcast %cst_4 : f32 to vector<1x128xf32>
    %14 = arith.addf %12, %13 : vector<1x128xf32>
    %15 = math.rsqrt %14 : vector<1x128xf32>
    %c0_5 = arith.constant 0 : index
    %c0_6 = arith.constant 0 : index
    %16 = vector.load %arg4[%c0_5, %c0_6] : memref<8x128xf32, #tpu.memory_space<vmem>>, vector<1x128xf32>
    %17 = arith.mulf %16, %15 : vector<1x128xf32>
    %c1 = arith.constant 1 : index
    %c0_7 = arith.constant 0 : index
    %18 = vector.load %arg4[%c1, %c0_7] : memref<8x128xf32, #tpu.memory_space<vmem>>, vector<1x128xf32>
    %19 = arith.mulf %5, %17 : vector<1x128xf32>
    %20 = arith.subf %18, %19 : vector<1x128xf32>
    %21 = vector.shape_cast %17 : vector<1x128xf32> to vector<1x1x128xf32>
    %22 = vector.shape_cast %20 : vector<1x128xf32> to vector<1x1x128xf32>
    %c0_8 = arith.constant 0 : index
    %c0_9 = arith.constant 0 : index
    %c0_10 = arith.constant 0 : index
    %23 = vector.load %arg2[%c0_8, %c0_9, %c0_10] : memref<4x64x128xbf16, #tpu.memory_space<vmem>>, vector<4x64x128xbf16>
    %24 = arith.extf %23 : vector<4x64x128xbf16> to vector<4x64x128xf32>
    %25 = vector.broadcast %21 : vector<1x1x128xf32> to vector<4x64x128xf32>
    %26 = arith.mulf %24, %25 : vector<4x64x128xf32>
    %27 = vector.broadcast %22 : vector<1x1x128xf32> to vector<4x64x128xf32>
    %28 = arith.addf %26, %27 : vector<4x64x128xf32>
    %cst_11 = arith.constant 0.000000e+00 : f32
    %29 = vector.broadcast %cst_11 : f32 to vector<4x64x128xf32>
    %30 = arith.maximumf %28, %29 : vector<4x64x128xf32>
    %cst_12 = arith.constant dense<0xFF800000> : vector<64x128xf32>
    %31 = vector.multi_reduction <maximumf>, %30, %cst_12 [0] : vector<4x64x128xf32> to vector<64x128xf32>
    %32 = arith.truncf %31 : vector<64x128xf32> to vector<64x128xbf16>
    %c0_13 = arith.constant 0 : index
    %c0_14 = arith.constant 0 : index
    %c0_15 = arith.constant 0 : index
    %33 = vector.load %arg5[%c0_13, %c0_14, %c0_15] : memref<1x64x128xbf16, #tpu.memory_space<vmem>>, vector<1x64x128xbf16>
    %34 = vector.shape_cast %33 : vector<1x64x128xbf16> to vector<64x128xbf16>
    %35 = vector.shape_cast %32 : vector<64x128xbf16> to vector<1x64x128xbf16>
    tpu.vector_store %arg5[%c0_13, %c0_14, %c0_15], %35 {strides = array<i32>} : memref<1x64x128xbf16, #tpu.memory_space<vmem>>, vector<1x64x128xbf16>,
    return
  }
  func.func @transform_0(%arg0: i32, %arg1: i32) -> (i32, i32, i32) {
    %c0_i32 = arith.constant 0 : i32
    %c0_i32_0 = arith.constant 0 : i32
    return %arg0, %arg1, %c0_i32 : i32, i32, i32
  }
  func.func @transform_1(%arg0: i32, %arg1: i32) -> (i32, i32) {
    %c0_i32 = arith.constant 0 : i32
    %c0_i32_0 = arith.constant 0 : i32
    %c0_i32_1 = arith.constant 0 : i32
    return %c0_i32, %c0_i32_0 : i32, i32
  }
  func.func @transform_2(%arg0: i32, %arg1: i32) -> (i32, i32) {
    %c0_i32 = arith.constant 0 : i32
    %c0_i32_0 = arith.constant 0 : i32
    %c0_i32_1 = arith.constant 0 : i32
    return %c0_i32, %c0_i32_0 : i32, i32
  }
  func.func @transform_3(%arg0: i32, %arg1: i32) -> (i32, i32, i32) {
    %c0_i32 = arith.constant 0 : i32
    %c0_i32_0 = arith.constant 0 : i32
    return %arg0, %arg1, %c0_i32 : i32, i32, i32
  }
}

module attributes {stable_mosaic.version = 11 : i64} {
  func.func @_conv_stats_kernel(%arg0: i32, %arg1: memref<64x288xbf16, #tpu.memory_space<vmem>>, %arg2: memref<288x128xbf16, #tpu.memory_space<vmem>>, %arg3: memref<64x128xbf16, #tpu.memory_space<vmem>>, %arg4: memref<8x128xf32, #tpu.memory_space<vmem>>) attributes {dimension_semantics = [#tpu.dimension_semantics<parallel>], iteration_bounds = array<i64: 2>, scalar_prefetch = 0 : i64, scratch_operands = 0 : i64, tpu.core_type = #tpu.core_type<tc>, window_params = [{transform_indices = @transform_0, window_bounds = array<i64: 64, 288>}, {pipeline_mode = #tpu.pipeline_mode<synchronous>, transform_indices = @transform_1, window_bounds = array<i64: 288, 128>}, {transform_indices = @transform_2, window_bounds = array<i64: 64, 128>}, {transform_indices = @transform_3, window_bounds = array<i64: 8, 128>}]} {
    %c0 = arith.constant 0 : index
    %c0_0 = arith.constant 0 : index
    %0 = vector.load %arg1[%c0, %c0_0] : memref<64x288xbf16, #tpu.memory_space<vmem>>, vector<64x288xbf16>
    %c0_1 = arith.constant 0 : index
    %c0_2 = arith.constant 0 : index
    %1 = vector.load %arg2[%c0_1, %c0_2] : memref<288x128xbf16, #tpu.memory_space<vmem>>, vector<288x128xbf16>
    %cst = arith.constant dense<0.000000e+00> : vector<64x128xf32>
    %2 = tpu.matmul %0, %1, %cst {dimension_numbers = #tpu.dot_dimension_numbers<[1], [0], [0], [1], [0, 0, 1, 1], [], []>} : vector<64x288xbf16>, vector<288x128xbf16>, vector<64x128xf32> -> vector<64x128xf32>
    %3 = arith.truncf %2 : vector<64x128xf32> to vector<64x128xbf16>
    %c0_3 = arith.constant 0 : index
    %c0_4 = arith.constant 0 : index
    %4 = vector.load %arg3[%c0_3, %c0_4] : memref<64x128xbf16, #tpu.memory_space<vmem>>, vector<64x128xbf16>
    tpu.vector_store %arg3[%c0_3, %c0_4], %3 {strides = array<i32>} : memref<64x128xbf16, #tpu.memory_space<vmem>>, vector<64x128xbf16>,
    %cst_5 = arith.constant dense<0.000000e+00> : vector<128xf32>
    %5 = vector.multi_reduction <add>, %2, %cst_5 [0] : vector<64x128xf32> to vector<128xf32>
    %6 = vector.shape_cast %5 : vector<128xf32> to vector<1x128xf32>
    %7 = arith.mulf %2, %2 : vector<64x128xf32>
    %cst_6 = arith.constant dense<0.000000e+00> : vector<128xf32>
    %8 = vector.multi_reduction <add>, %7, %cst_6 [0] : vector<64x128xf32> to vector<128xf32>
    %9 = vector.shape_cast %8 : vector<128xf32> to vector<1x128xf32>
    %10 = tpu.iota {dimensions = array<i32: 0>} : vector<8x128xi32>
    %c0_i32 = arith.constant 0 : i32
    %11 = vector.broadcast %c0_i32 : i32 to vector<8x128xi32>
    %12 = arith.cmpi eq, %10, %11 : vector<8x128xi32>
    %13 = vector.shape_cast %6 : vector<1x128xf32> to vector<1x128xf32>
    %14 = vector.broadcast %13 : vector<1x128xf32> to vector<8x128xf32>
    %c1_i32 = arith.constant 1 : i32
    %15 = vector.broadcast %c1_i32 : i32 to vector<8x128xi32>
    %16 = arith.cmpi eq, %10, %15 : vector<8x128xi32>
    %17 = vector.shape_cast %9 : vector<1x128xf32> to vector<1x128xf32>
    %18 = vector.broadcast %17 : vector<1x128xf32> to vector<8x128xf32>
    %cst_7 = arith.constant 0.000000e+00 : f32
    %19 = vector.broadcast %cst_7 : f32 to vector<8x128xf32>
    %20 = arith.select %16, %18, %19 : vector<8x128xi1>, vector<8x128xf32>
    %21 = arith.select %12, %14, %20 : vector<8x128xi1>, vector<8x128xf32>
    %c0_8 = arith.constant 0 : index
    %c0_9 = arith.constant 0 : index
    %22 = vector.load %arg4[%c0_8, %c0_9] : memref<8x128xf32, #tpu.memory_space<vmem>>, vector<8x128xf32>
    tpu.vector_store %arg4[%c0_8, %c0_9], %21 {strides = array<i32>} : memref<8x128xf32, #tpu.memory_space<vmem>>, vector<8x128xf32>,
    return
  }
  func.func @transform_0(%arg0: i32) -> (i32, i32) {
    %c0_i32 = arith.constant 0 : i32
    %c0_i32_0 = arith.constant 0 : i32
    return %arg0, %c0_i32 : i32, i32
  }
  func.func @transform_1(%arg0: i32) -> (i32, i32) {
    %c0_i32 = arith.constant 0 : i32
    %c0_i32_0 = arith.constant 0 : i32
    %c0_i32_1 = arith.constant 0 : i32
    return %c0_i32, %c0_i32_0 : i32, i32
  }
  func.func @transform_2(%arg0: i32) -> (i32, i32) {
    %c0_i32 = arith.constant 0 : i32
    %c0_i32_0 = arith.constant 0 : i32
    return %arg0, %c0_i32 : i32, i32
  }
  func.func @transform_3(%arg0: i32) -> (i32, i32) {
    %c0_i32 = arith.constant 0 : i32
    %c0_i32_0 = arith.constant 0 : i32
    return %arg0, %c0_i32 : i32, i32
  }
}

module attributes {stable_mosaic.version = 11 : i64} {
  func.func @_bn_relu_pool_kernel(%arg0: i32, %arg1: i32, %arg2: memref<4x16x128xbf16, #tpu.memory_space<vmem>>, %arg3: memref<16x128xf32, #tpu.memory_space<vmem>>, %arg4: memref<8x128xf32, #tpu.memory_space<vmem>>, %arg5: memref<1x16x128xf32, #tpu.memory_space<vmem>>) attributes {dimension_semantics = [#tpu.dimension_semantics<parallel>, #tpu.dimension_semantics<parallel>], iteration_bounds = array<i64: 2, 1>, scalar_prefetch = 0 : i64, scratch_operands = 0 : i64, tpu.core_type = #tpu.core_type<tc>, window_params = [{transform_indices = @transform_0, window_bounds = array<i64: 4, 16, 128>}, {pipeline_mode = #tpu.pipeline_mode<synchronous>, transform_indices = @transform_1, window_bounds = array<i64: 16, 128>}, {pipeline_mode = #tpu.pipeline_mode<synchronous>, transform_indices = @transform_2, window_bounds = array<i64: 8, 128>}, {transform_indices = @transform_3, window_bounds = array<i64: 1, 16, 128>}]} {
    %c0 = arith.constant 0 : index
    %c0_0 = arith.constant 0 : index
    %0 = vector.load %arg3[%c0, %c0_0] : memref<16x128xf32, #tpu.memory_space<vmem>>, vector<16x128xf32>
    %1 = vector.shape_cast %0 : vector<16x128xf32> to vector<2x8x128xf32>
    %cst = arith.constant dense<0.000000e+00> : vector<8x128xf32>
    %2 = vector.multi_reduction <add>, %1, %cst [0] : vector<2x8x128xf32> to vector<8x128xf32>
    %3 = vector.extract_strided_slice %2 {offsets = [0, 0], sizes = [1, 128], strides = [1, 1]} : vector<8x128xf32> to vector<1x128xf32>
    %cst_1 = arith.constant 7.812500e-03 : f32
    %4 = vector.broadcast %cst_1 : f32 to vector<1x128xf32>
    %5 = arith.mulf %3, %4 : vector<1x128xf32>
    %6 = vector.extract_strided_slice %2 {offsets = [1, 0], sizes = [1, 128], strides = [1, 1]} : vector<8x128xf32> to vector<1x128xf32>
    %cst_2 = arith.constant 7.812500e-03 : f32
    %7 = vector.broadcast %cst_2 : f32 to vector<1x128xf32>
    %8 = arith.mulf %6, %7 : vector<1x128xf32>
    %9 = arith.mulf %5, %5 : vector<1x128xf32>
    %10 = arith.subf %8, %9 : vector<1x128xf32>
    %cst_3 = arith.constant 0.000000e+00 : f32
    %11 = vector.broadcast %cst_3 : f32 to vector<1x128xf32>
    %12 = arith.maximumf %10, %11 : vector<1x128xf32>
    %cst_4 = arith.constant 9.99999974E-6 : f32
    %13 = vector.broadcast %cst_4 : f32 to vector<1x128xf32>
    %14 = arith.addf %12, %13 : vector<1x128xf32>
    %15 = math.rsqrt %14 : vector<1x128xf32>
    %c0_5 = arith.constant 0 : index
    %c0_6 = arith.constant 0 : index
    %16 = vector.load %arg4[%c0_5, %c0_6] : memref<8x128xf32, #tpu.memory_space<vmem>>, vector<1x128xf32>
    %17 = arith.mulf %16, %15 : vector<1x128xf32>
    %c1 = arith.constant 1 : index
    %c0_7 = arith.constant 0 : index
    %18 = vector.load %arg4[%c1, %c0_7] : memref<8x128xf32, #tpu.memory_space<vmem>>, vector<1x128xf32>
    %19 = arith.mulf %5, %17 : vector<1x128xf32>
    %20 = arith.subf %18, %19 : vector<1x128xf32>
    %21 = vector.shape_cast %17 : vector<1x128xf32> to vector<1x1x128xf32>
    %22 = vector.shape_cast %20 : vector<1x128xf32> to vector<1x1x128xf32>
    %c0_8 = arith.constant 0 : index
    %c0_9 = arith.constant 0 : index
    %c0_10 = arith.constant 0 : index
    %23 = vector.load %arg2[%c0_8, %c0_9, %c0_10] : memref<4x16x128xbf16, #tpu.memory_space<vmem>>, vector<4x16x128xbf16>
    %24 = arith.extf %23 : vector<4x16x128xbf16> to vector<4x16x128xf32>
    %25 = vector.broadcast %21 : vector<1x1x128xf32> to vector<4x16x128xf32>
    %26 = arith.mulf %24, %25 : vector<4x16x128xf32>
    %27 = vector.broadcast %22 : vector<1x1x128xf32> to vector<4x16x128xf32>
    %28 = arith.addf %26, %27 : vector<4x16x128xf32>
    %cst_11 = arith.constant 0.000000e+00 : f32
    %29 = vector.broadcast %cst_11 : f32 to vector<4x16x128xf32>
    %30 = arith.maximumf %28, %29 : vector<4x16x128xf32>
    %cst_12 = arith.constant dense<0xFF800000> : vector<16x128xf32>
    %31 = vector.multi_reduction <maximumf>, %30, %cst_12 [0] : vector<4x16x128xf32> to vector<16x128xf32>
    %c0_13 = arith.constant 0 : index
    %c0_14 = arith.constant 0 : index
    %c0_15 = arith.constant 0 : index
    %32 = vector.load %arg5[%c0_13, %c0_14, %c0_15] : memref<1x16x128xf32, #tpu.memory_space<vmem>>, vector<1x16x128xf32>
    %33 = vector.shape_cast %32 : vector<1x16x128xf32> to vector<16x128xf32>
    %34 = vector.shape_cast %31 : vector<16x128xf32> to vector<1x16x128xf32>
    tpu.vector_store %arg5[%c0_13, %c0_14, %c0_15], %34 {strides = array<i32>} : memref<1x16x128xf32, #tpu.memory_space<vmem>>, vector<1x16x128xf32>,
    return
  }
  func.func @transform_0(%arg0: i32, %arg1: i32) -> (i32, i32, i32) {
    %c0_i32 = arith.constant 0 : i32
    %c0_i32_0 = arith.constant 0 : i32
    return %arg0, %arg1, %c0_i32 : i32, i32, i32
  }
  func.func @transform_1(%arg0: i32, %arg1: i32) -> (i32, i32) {
    %c0_i32 = arith.constant 0 : i32
    %c0_i32_0 = arith.constant 0 : i32
    %c0_i32_1 = arith.constant 0 : i32
    return %c0_i32, %c0_i32_0 : i32, i32
  }
  func.func @transform_2(%arg0: i32, %arg1: i32) -> (i32, i32) {
    %c0_i32 = arith.constant 0 : i32
    %c0_i32_0 = arith.constant 0 : i32
    %c0_i32_1 = arith.constant 0 : i32
    return %c0_i32, %c0_i32_0 : i32, i32
  }
  func.func @transform_3(%arg0: i32, %arg1: i32) -> (i32, i32, i32) {
    %c0_i32 = arith.constant 0 : i32
    %c0_i32_0 = arith.constant 0 : i32
    return %arg0, %arg1, %c0_i32 : i32, i32, i32
  }
}

</mosaic_0001>

<bundles_post_ra>
// kernel: cnn_encoder_forward.4
= control target key start
LH: loop header
LB: loop body
LE: loop exit
PB: predicated region body
PF: predicated region fallthrough
CT: control target
= control target key end

     0   :  { %s1194_s12 = smov 0   ;;  %s1341_s0 = inlined_call_operand.vmem [shape: bf16[512,9], index: 0, kind: input, shape index: {}]   ;;  %s1342_s1 = inlined_call_operand.vmem [shape: bf16[9,128], index: 1, kind: input, shape index: {}]   ;;  %s1343_s2 = inlined_call_operand.vmem [shape: bf16[512,128], index: 2, kind: output, shape index: {0}]   ;;  %s1344_s3 = inlined_call_operand.vmem [shape: f32[16,128], index: 3, kind: output, shape index: {1}]  }
   0x1 LB: > { %s1200_s13 = sadd.s32 4294967295, %s1171_s12   ;;  %p886_p0 = scmp.ge.s32.totalorder %s1171_s12, 1  ;;  %s1171_s12 = sphi %s1194_s12, %s14_s12  }
   0x2   : > { %p141_p1 = scmp.lt.s32.totalorder %s1171_s12, 3 }
   0x4   : > { %p142_p2 = pnand %p886_p0, %p141_p1 }
   0x5   : > { %v1148_v0 = vld [vmem:[%s1342_s1] sm:$0x1f] (!%p142_p2)   ;;  %vm354_vm0 = vcmask (!%p142_p2), 1043456   ;;  %vm355_vm1 = vcmask (!%p142_p2), 1044480   ;;  %s887_s16 = sshll.u32 (!%p142_p2), %s1200_s13, 5  ;;  %v1173_v1 = vmov (!%p142_p2), 65535  }
   0x6   : > { %145 = sbr.rel (%p142_p2) target bundleno = 312 (0x138), region = 28  ;;  %v356_v2 = vsel (!%p142_p2), %vm354_vm0, 4294967295, %v1173_v1  ;;  %p170_p3 = scmp.lt.s32.totalorder (!%p142_p2), %s887_s16, 63  ;;  %vm305_vm2 = vcmask (!%p142_p2), 72704  }
   0x7   : > { %v357_v3 = vsel (!%p142_p2), %vm355_vm1, %v356_v2, 0  ;;  %p181_p4 = scmp.lt.s32.totalorder (!%p142_p2), %s1200_s13, 1 }
   0x8   : > { %v359_v4 = vand.u32 (!%p142_p2), %v1148_v0, %v357_v3 }
   0xa   : > { %1103 = vmatprep.subr.bf16.mxu0 (!%p142_p2), %v359_v4  ;;  %1137 = vmatprep.subr.bf16.mxu1 (!%p142_p2), %v359_v4 }
   0xb   : > { %1104 = vmatpush3.bf16.msra.mxu0 (!%p142_p2), %v359_v4  ;;  %1138 = vmatpush3.bf16.msra.mxu1 (!%p142_p2), %v359_v4 }
   0xd   : > { %s1346_s16 = smov (!%p170_p3, %s887_s16), 63  ;;  %s1348_s13 = smov (!%p181_p4, %s1200_s13), 1 }
   0xe   : > { %s888_s17 = sshll.u32 %s1346_s16, 2  ;;  %s891_s24 = sshll.u32 %s1348_s13, 3 }
   0xf   : > { %s1216_s20 = scalar_lea.vmem %s1341_s0, %s888_s17  ;;  %s1255_s23 = scalar_lea.vmem %s1343_s2, %s888_s17 }
  0x10   : > { %v1149_v5 = vld [vmem:[%s1216_s20] sm:$0xff]   ;;  %v1150_v6 = vld [vmem:[%s1216_s20 + $0x8] sm:$0xff]   ;;  %v1151_v7 = vld [vmem:[%s1216_s20 + $0x10] sm:$0xff]   ;;  %s184_s27 = scalar_lea.vmem %s1344_s3, %s891_s24 }
  0x11   : > { %1105 = vmatprep.mubr.msk.bf16.mxu0 %vm305_vm2, %v1149_v5  ;;  %v1152_v8 = vld [vmem:[%s1216_s20 + $0x18] sm:$0xff]   ;;  %v1153_v9 = vld [vmem:[%s1216_s20 + $0x20] sm:$0xff]   ;;  %v1158_v11 = vld [vmem:[%s1216_s20 + $0x48] sm:$0xff]  }
  0x12   : > { %1106 = vmatmul.mubr.msk.bf16.vlgmr.msra.gmra.mrb[0].mxu0 %vm305_vm2, %v1150_v6  ;;  %v1157_v10 = vld [vmem:[%s1216_s20 + $0x40] sm:$0xff]   ;;  %v1159_v12 = vld [vmem:[%s1216_s20 + $0x50] sm:$0xff]   ;;  %v1154_v13 = vld [vmem:[%s1216_s20 + $0x28] sm:$0xff]  }
  0x13   : > { %1109 = vmatprep.mubr.msk.bf16.mxu0 %vm305_vm2, %v1151_v7  ;;  %1121 = vmatprep.mubr.msk.bf16.mxu1 %vm305_vm2, %v1157_v10  ;;  %v1160_v14 = vld [vmem:[%s1216_s20 + $0x58] sm:$0xff]   ;;  %v1155_v15 = vld [vmem:[%s1216_s20 + $0x30] sm:$0xff]   ;;  %v1161_v16 = vld [vmem:[%s1216_s20 + $0x60] sm:$0xff]  }
  0x14   : > { %1122 = vmatmul.mubr.msk.bf16.vlgmr.msra.gmra.mrb[0].mxu1 %vm305_vm2, %v1158_v11  ;;  %v1156_v17 = vld [vmem:[%s1216_s20 + $0x38] sm:$0xff]   ;;  %v1162_v18 = vld [vmem:[%s1216_s20 + $0x68] sm:$0xff]   ;;  %v1163_v19 = vld [vmem:[%s1216_s20 + $0x70] sm:$0xff]  }
  0x15   : > { %1125 = vmatprep.mubr.msk.bf16.mxu1 %vm305_vm2, %v1159_v12  ;;  %v1164_v20 = vld [vmem:[%s1216_s20 + $0x78] sm:$0xff]  }
  0x1a   : > { %1110 = vmatmul.mubr.msk.bf16.gmra.mrb[4].mxu0 %vm305_vm2, %v1152_v8 }
  0x1b   : > { %1113 = vmatprep.mubr.msk.bf16.mxu0 %vm305_vm2, %v1153_v9 }
  0x1c   : > { %1126 = vmatmul.mubr.msk.bf16.gmra.mrb[4].mxu1 %vm305_vm2, %v1160_v14 }
  0x1d   : > { %1129 = vmatprep.mubr.msk.bf16.mxu1 %vm305_vm2, %v1161_v16 }
  0x22   : > { %1114 = vmatmul.mubr.msk.bf16.gmra.mrb[8].mxu0 %vm305_vm2, %v1154_v13 }
  0x23   : > { %1117 = vmatprep.mubr.msk.bf16.mxu0 %vm305_vm2, %v1155_v15 }
  0x24   : > { %1130 = vmatmul.mubr.msk.bf16.gmra.mrb[8].mxu1 %vm305_vm2, %v1162_v18 }
  0x25   : > { %1133 = vmatprep.mubr.msk.bf16.mxu1 %vm305_vm2, %v1163_v19 }
  0x2a   : > { %1118 = vmatmul.mubr.msk.bf16.gmra.mrb[12].mxu0 %vm305_vm2, %v1156_v17 }
  0x2c   : > { %1134 = vmatmul.mubr.msk.bf16.gmra.mrb[12].mxu1 %vm305_vm2, %v1164_v20 }
  0xe5   : > { %v1107_v21 = vpop.f32.mrb[0].mxu0 }
  0xe6   : > { %v395_v22 = vpop.f32.mrb[1].mxu0  ;;  %v721_v30 = vmul.f32 %v1107_v21, %v1107_v21 }
  0xe7   : > { %v1108_v23 = vpop.f32.mrb[2].mxu0  ;;  %v719_v26 = vmul.f32 %v395_v22, %v395_v22  ;;  %v1259_v37 = vpop.f32.mrb[0].mxu1 }
  0xe8   : > { %v999_v24 = vpack.c.bf16 %v1108_v23, %v1107_v21  ;;  %v398_v25 = vpop.f32.mrb[3].mxu0  ;;  %v722_v33 = vmul.f32 %v1108_v23, %v1108_v23  ;;  %v1261_v39 = vpop.f32.mrb[1].mxu1 }
  0xe9   : > { %v994_v27 = vpack.c.bf16 %v398_v25, %v395_v22  ;;  %v682_v28 = vadd.f32 %v398_v25, %v395_v22  ;;  %v720_v29 = vmul.f32 %v398_v25, %v398_v25  ;;  %v1263_v44 = vpop.f32.mrb[2].mxu1 }
  0xea   : > { %1071 = vst [vmem:[%s1255_s23 + $0x8] sm:$0xff] %v999_v24   ;;  %v1039_v47 = vpack.c.bf16 %v1263_v44, %v1259_v37  ;;  %v1267_v48 = vpop.f32.mrb[3].mxu1 }
  0xeb   : > { %995 = vst [vmem:[%s1255_s23] sm:$0xff] %v994_v27   ;;  %v683_v31 = vadd.f32 %v1107_v21, %v682_v28  ;;  %v751_v32 = vadd.f32 %v720_v29, %v719_v26  ;;  %v1034_v53 = vpack.c.bf16 %v1267_v48, %v1261_v39 }
  0xec   : > { %1079 = vst [vmem:[%s1255_s23 + $0x48] sm:$0xff] %v1039_v47   ;;  %v735_v47 = vmul.f32 %v1261_v39, %v1261_v39 }
  0xed   : > { %v752_v34 = vadd.f32 %v751_v32, %v721_v30  ;;  %v1111_v35 = vpop.f32.mrb[4].mxu0  ;;  %v684_v36 = vadd.f32 %v1108_v23, %v683_v31  ;;  %1078 = vst [vmem:[%s1255_s23 + $0x40] sm:$0xff] %v1034_v53  }
  0xee   : > { %v411_v38 = vpop.f32.mrb[5].mxu0  ;;  %v725_v54 = vmul.f32 %v1111_v35, %v1111_v35 }
  0xef   : > { %v685_v40 = vadd.f32 %v684_v36, %v411_v38  ;;  %v723_v41 = vmul.f32 %v411_v38, %v411_v38  ;;  %v753_v42 = vadd.f32 %v752_v34, %v722_v33  ;;  %v1112_v43 = vpop.f32.mrb[6].mxu0  ;;  %v1275_v61 = vpop.f32.mrb[4].mxu1 }
  0xf0   : > { %v1009_v45 = vpack.c.bf16 %v1112_v43, %v1111_v35  ;;  %v414_v46 = vpop.f32.mrb[7].mxu0  ;;  %v726_v57 = vmul.f32 %v1112_v43, %v1112_v43  ;;  %v1277_v63 = vpop.f32.mrb[5].mxu1 }
  0xf1   : > { %v754_v49 = vadd.f32 %v753_v42, %v723_v41  ;;  %v1004_v50 = vpack.c.bf16 %v414_v46, %v411_v38  ;;  %v686_v51 = vadd.f32 %v685_v40, %v414_v46  ;;  %v724_v52 = vmul.f32 %v414_v46, %v414_v46  ;;  %v1279_v4 = vpop.f32.mrb[6].mxu1 }
  0xf2   : > { %1073 = vst [vmem:[%s1255_s23 + $0x18] sm:$0xff] %v1009_v45   ;;  %v1049_v7 = vpack.c.bf16 %v1279_v4, %v1275_v61  ;;  %v1283_v8 = vpop.f32.mrb[7].mxu1 }
  0xf3   : > { %1072 = vst [vmem:[%s1255_s23 + $0x10] sm:$0xff] %v1004_v50   ;;  %v687_v55 = vadd.f32 %v1111_v35, %v686_v51  ;;  %v755_v56 = vadd.f32 %v754_v49, %v724_v52  ;;  %v1044_v13 = vpack.c.bf16 %v1283_v8, %v1277_v63 }
  0xf4   : > { %1081 = vst [vmem:[%s1255_s23 + $0x58] sm:$0xff] %v1049_v7  }
  0xf5   : > { %v756_v58 = vadd.f32 %v755_v56, %v725_v54  ;;  %v1115_v59 = vpop.f32.mrb[8].mxu0  ;;  %v688_v60 = vadd.f32 %v1112_v43, %v687_v55  ;;  %1080 = vst [vmem:[%s1255_s23 + $0x50] sm:$0xff] %v1044_v13  }
  0xf6   : > { %v427_v62 = vpop.f32.mrb[9].mxu0  ;;  %v729_v14 = vmul.f32 %v1115_v59, %v1115_v59 }
  0xf7   : > { %v689_v0 = vadd.f32 %v688_v60, %v427_v62  ;;  %v727_v1 = vmul.f32 %v427_v62, %v427_v62  ;;  %v757_v2 = vadd.f32 %v756_v58, %v726_v57  ;;  %v1116_v3 = vpop.f32.mrb[10].mxu0  ;;  %v1291_v21 = vpop.f32.mrb[8].mxu1  ;;  %v736_v58 = vmul.f32 %v1267_v48, %v1267_v48 }
  0xf8   : > { %v1019_v5 = vpack.c.bf16 %v1116_v3, %v1115_v59  ;;  %v430_v6 = vpop.f32.mrb[11].mxu0  ;;  %v730_v17 = vmul.f32 %v1116_v3, %v1116_v3  ;;  %v491_v23 = vpop.f32.mrb[9].mxu1  ;;  %v737_v60 = vmul.f32 %v1259_v37, %v1259_v37 }
  0xf9   : > { %v758_v9 = vadd.f32 %v757_v2, %v727_v1  ;;  %v1014_v10 = vpack.c.bf16 %v430_v6, %v427_v62  ;;  %v690_v11 = vadd.f32 %v689_v0, %v430_v6  ;;  %v728_v12 = vmul.f32 %v430_v6, %v430_v6  ;;  %v1293_v28 = vpop.f32.mrb[10].mxu1 }
  0xfa   : > { %1075 = vst [vmem:[%s1255_s23 + $0x28] sm:$0xff] %v1019_v5   ;;  %v1059_v31 = vpack.c.bf16 %v1293_v28, %v1291_v21  ;;  %v494_v32 = vpop.f32.mrb[11].mxu1 }
  0xfb   : > { %1074 = vst [vmem:[%s1255_s23 + $0x20] sm:$0xff] %v1014_v10   ;;  %v691_v15 = vadd.f32 %v1115_v59, %v690_v11  ;;  %v759_v16 = vadd.f32 %v758_v9, %v728_v12  ;;  %v1054_v38 = vpack.c.bf16 %v494_v32, %v491_v23  ;;  %v741_v9 = vmul.f32 %v1275_v61, %v1275_v61 }
  0xfc   : > { %1083 = vst [vmem:[%s1255_s23 + $0x68] sm:$0xff] %v1059_v31  }
  0xfd   : > { %v760_v18 = vadd.f32 %v759_v16, %v729_v14  ;;  %v1119_v19 = vpop.f32.mrb[12].mxu0  ;;  %v692_v20 = vadd.f32 %v1116_v3, %v691_v15  ;;  %1082 = vst [vmem:[%s1255_s23 + $0x60] sm:$0xff] %v1054_v38   ;;  %v739_v3 = vmul.f32 %v1277_v63, %v1277_v63 }
  0xfe   : > { %v443_v22 = vpop.f32.mrb[13].mxu0  ;;  %v733_v40 = vmul.f32 %v1119_v19, %v1119_v19 }
  0xff   : > { %v693_v24 = vadd.f32 %v692_v20, %v443_v22  ;;  %v731_v25 = vmul.f32 %v443_v22, %v443_v22  ;;  %v761_v26 = vadd.f32 %v760_v18, %v730_v17  ;;  %v1120_v27 = vpop.f32.mrb[14].mxu0  ;;  %v1135_v49 = vpop.f32.mrb[12].mxu1  ;;  %v744_v18 = vmul.f32 %v494_v32, %v494_v32 }
 0x100   : > { %v1029_v29 = vpack.c.bf16 %v1120_v27, %v1119_v19  ;;  %v446_v30 = vpop.f32.mrb[15].mxu0  ;;  %v734_v43 = vmul.f32 %v1120_v27, %v1120_v27  ;;  %v507_v50 = vpop.f32.mrb[13].mxu1 }
 0x101   : > { %v762_v33 = vadd.f32 %v761_v26, %v731_v25  ;;  %v1024_v34 = vpack.c.bf16 %v446_v30, %v443_v22  ;;  %v694_v35 = vadd.f32 %v693_v24, %v446_v30  ;;  %v732_v36 = vmul.f32 %v446_v30, %v446_v30  ;;  %v1136_v53 = vpop.f32.mrb[14].mxu1 }
 0x102   : > { %1077 = vst [vmem:[%s1255_s23 + $0x38] sm:$0xff] %v1029_v29   ;;  %v1069_v54 = vpack.c.bf16 %v1136_v53, %v1135_v49  ;;  %v510_v55 = vpop.f32.mrb[15].mxu1  ;;  %v749_v30 = vmul.f32 %v1135_v49, %v1135_v49 }
 0x103   : > { %1076 = vst [vmem:[%s1255_s23 + $0x30] sm:$0xff] %v1024_v34   ;;  %v695_v41 = vadd.f32 %v1119_v19, %v694_v35  ;;  %v763_v42 = vadd.f32 %v762_v33, %v732_v36  ;;  %v1064_v59 = vpack.c.bf16 %v510_v55, %v507_v50  ;;  %v748_v29 = vmul.f32 %v510_v55, %v510_v55 }
 0x104   : > { %1085 = vst [vmem:[%s1255_s23 + $0x78] sm:$0xff] %v1069_v54   ;;  %v750_v33 = vmul.f32 %v1136_v53, %v1136_v53 }
 0x105   : > { %v764_v45 = vadd.f32 %v763_v42, %v733_v40  ;;  %v696_v46 = vadd.f32 %v1120_v27, %v695_v41  ;;  %1084 = vst [vmem:[%s1255_s23 + $0x70] sm:$0xff] %v1064_v59   ;;  %v788_v41 = vlaneseq }
 0x107   : > { %v697_v51 = vadd.f32 %v696_v46, %v1261_v39  ;;  %v765_v52 = vadd.f32 %v764_v45, %v734_v43  ;;  %v738_v39 = vmul.f32 %v1263_v44, %v1263_v44  ;;  %v789_v46 = vshrl.u32 %v788_v41, 7 }
 0x109   : > { %v766_v56 = vadd.f32 %v765_v52, %v735_v47  ;;  %v698_v57 = vadd.f32 %v697_v51, %v1267_v48  ;;  %vm791_vm3 = vcmp.eq.s32.totalorder %v789_v46, 1  ;;  %vm790_vm4 = vcmp.eq.s32.totalorder %v789_v46, 0 }
 0x10b   : > { %v699_v62 = vadd.f32 %v1259_v37, %v698_v57  ;;  %v767_v0 = vadd.f32 %v766_v56, %v736_v58  ;;  %v740_v37 = vmul.f32 %v1283_v8, %v1283_v8 }
 0x10d   : > { %v768_v1 = vadd.f32 %v767_v0, %v737_v60  ;;  %v700_v2 = vadd.f32 %v1263_v44, %v699_v62  ;;  %v742_v44 = vmul.f32 %v1279_v4, %v1279_v4 }
 0x10f   : > { %v701_v48 = vadd.f32 %v700_v2, %v1277_v63  ;;  %v769_v5 = vadd.f32 %v768_v1, %v738_v39  ;;  %v743_v63 = vmul.f32 %v491_v23, %v491_v23 }
 0x111   : > { %v770_v6 = vadd.f32 %v769_v5, %v739_v3  ;;  %v702_v7 = vadd.f32 %v701_v48, %v1283_v8  ;;  %v745_v8 = vmul.f32 %v1291_v21, %v1291_v21 }
 0x113   : > { %v703_v10 = vadd.f32 %v1275_v61, %v702_v7  ;;  %v771_v11 = vadd.f32 %v770_v6, %v740_v37  ;;  %v746_v61 = vmul.f32 %v1293_v28, %v1293_v28 }
 0x115   : > { %v772_v12 = vadd.f32 %v771_v11, %v741_v9  ;;  %v704_v13 = vadd.f32 %v1279_v4, %v703_v10  ;;  %v747_v4 = vmul.f32 %v507_v50, %v507_v50 }
 0x117   : > { %v705_v14 = vadd.f32 %v704_v13, %v491_v23  ;;  %v773_v15 = vadd.f32 %v772_v12, %v742_v44 }
 0x119   : > { %v774_v16 = vadd.f32 %v773_v15, %v743_v63  ;;  %v706_v17 = vadd.f32 %v705_v14, %v494_v32 }
 0x11b   : > { %v707_v19 = vadd.f32 %v1291_v21, %v706_v17  ;;  %v775_v20 = vadd.f32 %v774_v16, %v744_v18 }
 0x11d   : > { %v776_v22 = vadd.f32 %v775_v20, %v745_v8  ;;  %v708_v24 = vadd.f32 %v1293_v28, %v707_v19 }
 0x11f   : > { %v709_v25 = vadd.f32 %v708_v24, %v507_v50  ;;  %v777_v23 = vadd.f32 %v776_v22, %v746_v61 }
 0x121   : > { %v778_v26 = vadd.f32 %v777_v23, %v747_v4  ;;  %v710_v27 = vadd.f32 %v709_v25, %v510_v55 }
 0x123   : > { %v711_v31 = vadd.f32 %v1135_v49, %v710_v27  ;;  %v779_v32 = vadd.f32 %v778_v26, %v748_v29 }
 0x125   : > { %v712_v21 = vadd.f32 %v1136_v53, %v711_v31  ;;  %v780_v34 = vadd.f32 %v779_v32, %v749_v30 }
 0x127   : > { %v713_v35 = vrot.slane %v712_v21, 4  ;;  %v781_v36 = vadd.f32 %v780_v34, %v750_v33 }
 0x129   : > { %v714_v38 = vadd.f32 %v713_v35, %v712_v21  ;;  %v782_v40 = vrot.slane %v781_v36, 4 }
 0x12b   : > { %v715_v28 = vrot.slane %v714_v38, 2  ;;  %v783_v42 = vadd.f32 %v782_v40, %v781_v36 }
 0x12d   : > { %v716_v43 = vadd.f32 %v715_v28, %v714_v38  ;;  %v784_v45 = vrot.slane %v783_v42, 2 }
 0x12f   : > { %v785_v47 = vadd.f32 %v784_v45, %v783_v42  ;;  %v717_v50 = vrot.slane %v716_v43, 1 }
 0x131   : > { %v786_v49 = vrot.slane %v785_v47, 1  ;;  %v718_v52 = vadd.f32 %v717_v50, %v716_v43 }
 0x133   : > { %v787_v51 = vadd.f32 %v786_v49, %v785_v47 }
 0x135   : > { %v792_v53 = vsel %vm791_vm3, %v787_v51, 0.0 }
 0x136   : > { %v793_v54 = vsel %vm790_vm4, %v718_v52, %v792_v53 }
 0x137   : > { %794 = vst [vmem:[%s184_s27] sm:$0xff] %v793_v54 }
 0x138 PF: > { %s14_s12 = sadd.s32 1, %s1171_s12  }
 0x139   : > { %p11_p5 = scmp.ge.s32.totalorder %s14_s12, 4  }
 0x13b   :  { %13 = sbr.rel (!%p11_p5) target bundleno = 1 (0x1), region = 70 }

// kernel: cnn_encoder_forward.5
= control target key start
LH: loop header
LB: loop body
LE: loop exit
PB: predicated region body
PF: predicated region fallthrough
CT: control target
= control target key end

     0   :  { %s756_s12 = smov 0   ;;  %s758_s13 = smov 0   ;;  %s988_s0 = inlined_call_operand.vmem [shape: bf16[8,64,128], index: 0, kind: input, shape index: {}]   ;;  %s989_s1 = inlined_call_operand.vmem [shape: f32[16,128], index: 1, kind: input, shape index: {}]   ;;  %s990_s2 = inlined_call_operand.vmem [shape: f32[8,128], index: 2, kind: input, shape index: {}]   ;;  %s991_s3 = inlined_call_operand.vmem [shape: bf16[2,64,128], index: 3, kind: output, shape index: {}]  }
   0x1   :  { %s760_s14 = smov 0  }
   0x2 LB: > { %s25_s15 = sadd.s32 1, %s730_s13  ;;  %p558_p0 = scmp.ge.s32.totalorder %s734_s14, 1  ;;  %s734_s14 = sphi %s760_s14, %s13_s14   ;;  %s730_s13 = sphi %s758_s13, %s993_s13   ;;  %s726_s12 = sphi %s756_s12, %s992_s12  }
   0x3   : > { %p27_p1 = scmp.ge.s32.totalorder %s25_s15, 2  ;;  %p160_p2 = scmp.lt.s32.totalorder %s734_s14, 3 }
   0x5   : > { %s995_s15 = smov (%p27_p1, %s25_s15), 0  ;;  %p161_p3 = pnand %p558_p0, %p160_p2 }
   0x6   : > { %v215_v0 = vld [vmem:[%s989_s1] sm:$0xff] (!%p161_p3)  ;;  %v216_v1 = vld [vmem:[%s989_s1 + $0x8] sm:$0xff] (!%p161_p3)  ;;  %s559_s20 = sshll.u32 (!%p161_p3), %s726_s12, 2  ;;  %v299_v9 = vlaneseq (!%p161_p3)  ;;  %p206_p5 = scmp.lt.s32.totalorder (!%p161_p3), %s726_s12, 1 }
   0x7   : > { %164 = sbr.rel (%p161_p3) target bundleno = 77 (0x4d), region = 32  ;;  %v217_v2 = vadd.f32 (!%p161_p3), %v216_v1, %v215_v0  ;;  %p195_p4 = scmp.lt.s32.totalorder (!%p161_p3), %s559_s20, 7  ;;  %v227_v31 = vld [vmem:[%s990_s2] sm:$0x1] (!%p161_p3)  ;;  %v232_v54 = vld [vmem:[%s990_s2 + $0x1] sm:$0x1] (!%p161_p3) }
   0x8   : > { %v788_v10 = vshrl.u32 (!%p161_p3), %v299_v9, 7 }
   0x9   : > { %v218_v3 = vmul.f32 (!%p161_p3), 0.001953125, %v217_v2 }
   0xa   : > { %v301_v15 = vsub.s32 (!%p161_p3), 0, %v788_v10 }
   0xb   : > { %v219_v4 = vmul.f32 (!%p161_p3), %v218_v3, %v218_v3 }
   0xd   : > { %v221_v5 = vrot.slane (!%p161_p3), %v219_v4, 7 }
   0xe   : > { %s997_s20 = smov (!%p195_p4, %s559_s20), 7  ;;  %s999_s12 = smov (!%p206_p5, %s726_s12), 1 }
   0xf   : > { %v223_v6 = vsub.f32 %v218_v3, %v221_v5  ;;  %s574_s21 = sshll.u32 %s997_s20, 5  ;;  %s575_s29 = sshll.u32 %s999_s12, 5 }
  0x10   : > { %s786_s24 = scalar_lea.vmem %s988_s0, %s574_s21  ;;  %s909_s5 = scalar_lea.vmem %s991_s3, %s575_s29 }
  0x11   : > { %v224_v7 = vmax.f32 %v223_v6, 0.0  ;;  %v585_v11 = vld [vmem:[%s786_s24] sm:$0xff]   ;;  %v798_v16 = vld [vmem:[%s786_s24 + $0x8] sm:$0xff]   ;;  %v810_v28 = vld [vmem:[%s786_s24 + $0x10] sm:$0xff]  }
  0x12   : > { %v671_v12 = vld [vmem:[%s786_s24 + $0x20] sm:$0xff]   ;;  %v801_v17 = vld [vmem:[%s786_s24 + $0x28] sm:$0xff]   ;;  %v586_v18 = vunpack.c.l.bf16 %v585_v11  ;;  %v587_v19 = vunpack.c.h.bf16 %v585_v11  ;;  %v813_v29 = vld [vmem:[%s786_s24 + $0x30] sm:$0xff]   ;;  %v590_v32 = vunpack.c.l.bf16 %v798_v16  ;;  %v591_v33 = vunpack.c.h.bf16 %v798_v16 }
  0x13   : > { %v225_v8 = vadd.f32 1e-05, %v224_v7  ;;  %v675_v13 = vld [vmem:[%s786_s24 + $0x40] sm:$0xff]   ;;  %v602_v20 = vunpack.c.l.bf16 %v671_v12  ;;  %v603_v21 = vunpack.c.h.bf16 %v671_v12  ;;  %v676_v22 = vld [vmem:[%s786_s24 + $0x48] sm:$0xff]   ;;  %v606_v34 = vunpack.c.l.bf16 %v801_v17  ;;  %v823_v36 = vld [vmem:[%s786_s24 + $0x50] sm:$0xff]  }
  0x14   : > { %v794_v14 = vld [vmem:[%s786_s24 + $0x60] sm:$0xff]   ;;  %v805_v23 = vld [vmem:[%s786_s24 + $0x68] sm:$0xff]   ;;  %v618_v24 = vunpack.c.l.bf16 %v675_v13  ;;  %v619_v25 = vunpack.c.h.bf16 %v675_v13  ;;  %v607_v35 = vunpack.c.h.bf16 %v801_v17  ;;  %v622_v38 = vunpack.c.l.bf16 %v676_v22  ;;  %v827_v41 = vld [vmem:[%s786_s24 + $0x70] sm:$0xff]  }
  0x15   : > { %710 = vrsqrt.f32 %v225_v8  ;;  %v634_v26 = vunpack.c.l.bf16 %v794_v14  ;;  %v635_v27 = vunpack.c.h.bf16 %v794_v14  ;;  %v623_v39 = vunpack.c.h.bf16 %v676_v22  ;;  %v830_v42 = vld [vmem:[%s786_s24 + $0x18] sm:$0xff]  }
  0x16   : > { %v638_v40 = vunpack.c.l.bf16 %v805_v23  ;;  %v639_v43 = vunpack.c.h.bf16 %v805_v23  ;;  %v594_v44 = vunpack.c.l.bf16 %v810_v28  ;;  %v595_v45 = vunpack.c.h.bf16 %v810_v28  ;;  %v837_v47 = vld [vmem:[%s786_s24 + $0x38] sm:$0xff]  }
  0x17   : > { %v610_v46 = vunpack.c.l.bf16 %v813_v29  ;;  %v611_v49 = vunpack.c.h.bf16 %v813_v29  ;;  %v626_v50 = vunpack.c.l.bf16 %v823_v36  ;;  %v627_v51 = vunpack.c.h.bf16 %v823_v36  ;;  %v843_v52 = vld [vmem:[%s786_s24 + $0x58] sm:$0xff]  }
  0x18   : > { %v846_v53 = vld [vmem:[%s786_s24 + $0x78] sm:$0xff]   ;;  %v642_v55 = vunpack.c.l.bf16 %v827_v41  ;;  %v643_v56 = vunpack.c.h.bf16 %v827_v41  ;;  %v598_v57 = vunpack.c.l.bf16 %v830_v42  ;;  %v599_v58 = vunpack.c.h.bf16 %v830_v42 }
  0x19   : > { %v614_v61 = vunpack.c.l.bf16 %v837_v47  ;;  %v615_v62 = vunpack.c.h.bf16 %v837_v47  ;;  %v630_v63 = vunpack.c.l.bf16 %v843_v52  ;;  %v631_v0 = vunpack.c.h.bf16 %v843_v52 }
  0x1a   : > { %v646_v1 = vunpack.c.l.bf16 %v846_v53  ;;  %v647_v2 = vunpack.c.h.bf16 %v846_v53 }
  0x1f   : > { %v711_v30 = vpop.eup %710 }
  0x20   : > { %v229_v37 = vrot.slane %v711_v30, 1 }
  0x22   : > { %v231_v48 = vmul.f32 %v229_v37, %v227_v31 }
  0x24   : > { %v233_v59 = vmul.f32 %v231_v48, %v218_v3  ;;  %v855_v60 = vrot.slane %v231_v48, %v301_v15 }
  0x26   : > { %v234_v4 = vsub.f32 %v232_v54, %v233_v59  ;;  %v303_v5 = vmul.f32 %v586_v18, %v855_v60  ;;  %v304_v3 = vmul.f32 %v587_v19, %v855_v60  ;;  %v311_v6 = vmul.f32 %v602_v20, %v855_v60 }
  0x27   : > { %v312_v7 = vmul.f32 %v603_v21, %v855_v60  ;;  %v319_v8 = vmul.f32 %v618_v24, %v855_v60  ;;  %v320_v9 = vmul.f32 %v619_v25, %v855_v60  ;;  %v327_v10 = vmul.f32 %v634_v26, %v855_v60 }
  0x28   : > { %v328_v11 = vmul.f32 %v635_v27, %v855_v60  ;;  %v872_v12 = vrot.slane %v234_v4, %v301_v15  ;;  %v305_v13 = vmul.f32 %v590_v32, %v855_v60  ;;  %v306_v14 = vmul.f32 %v591_v33, %v855_v60 }
  0x29   : > { %v313_v16 = vmul.f32 %v606_v34, %v855_v60  ;;  %v314_v17 = vmul.f32 %v607_v35, %v855_v60  ;;  %v321_v18 = vmul.f32 %v622_v38, %v855_v60  ;;  %v322_v19 = vmul.f32 %v623_v39, %v855_v60 }
  0x2a   : > { %v339_v20 = vadd.f32 %v872_v12, %v303_v5  ;;  %v340_v21 = vadd.f32 %v872_v12, %v304_v3  ;;  %v347_v22 = vadd.f32 %v872_v12, %v311_v6  ;;  %v348_v15 = vadd.f32 %v872_v12, %v312_v7 }
  0x2b   : > { %v355_v24 = vadd.f32 %v872_v12, %v319_v8  ;;  %v356_v25 = vadd.f32 %v872_v12, %v320_v9  ;;  %v363_v26 = vadd.f32 %v872_v12, %v327_v10  ;;  %v364_v27 = vadd.f32 %v872_v12, %v328_v11 }
  0x2c   : > { %v371_v30 = vmax.f32 %v339_v20, 0.0  ;;  %v372_v31 = vmax.f32 %v340_v21, 0.0  ;;  %v379_v32 = vmax.f32 %v347_v22, 0.0  ;;  %v380_v33 = vmax.f32 %v348_v15, 0.0 }
  0x2d   : > { %v387_v34 = vmax.f32 %v355_v24, 0.0  ;;  %v388_v35 = vmax.f32 %v356_v25, 0.0  ;;  %v395_v37 = vmax.f32 %v363_v26, 0.0  ;;  %v396_v38 = vmax.f32 %v364_v27, 0.0 }
  0x2e   : > { %v403_v39 = vmax.f32 %v371_v30, %v379_v32  ;;  %v406_v48 = vmax.f32 %v372_v31, %v380_v33  ;;  %v329_v54 = vmul.f32 %v638_v40, %v855_v60  ;;  %v330_v59 = vmul.f32 %v639_v43, %v855_v60 }
  0x2f   : > { %v341_v4 = vadd.f32 %v872_v12, %v305_v13  ;;  %v342_v5 = vadd.f32 %v872_v12, %v306_v14  ;;  %v349_v3 = vadd.f32 %v872_v12, %v313_v16  ;;  %v350_v6 = vadd.f32 %v872_v12, %v314_v17 }
  0x30   : > { %v404_v7 = vmax.f32 %v403_v39, %v387_v34  ;;  %v407_v8 = vmax.f32 %v406_v48, %v388_v35  ;;  %v357_v9 = vadd.f32 %v872_v12, %v321_v18  ;;  %v358_v10 = vadd.f32 %v872_v12, %v322_v19 }
  0x31   : > { %v365_v23 = vadd.f32 %v872_v12, %v329_v54  ;;  %v366_v40 = vadd.f32 %v872_v12, %v330_v59  ;;  %v373_v43 = vmax.f32 %v341_v4, 0.0  ;;  %v374_v11 = vmax.f32 %v342_v5, 0.0 }
  0x32   : > { %v405_v13 = vmax.f32 %v404_v7, %v395_v37  ;;  %v408_v20 = vmax.f32 %v407_v8, %v396_v38  ;;  %v381_v14 = vmax.f32 %v349_v3, 0.0  ;;  %v382_v21 = vmax.f32 %v350_v6, 0.0 }
  0x33   : > { %v389_v16 = vmax.f32 %v357_v9, 0.0  ;;  %v390_v17 = vmax.f32 %v358_v10, 0.0  ;;  %v397_v18 = vmax.f32 %v365_v23, 0.0  ;;  %v398_v19 = vmax.f32 %v366_v40, 0.0 }
  0x34   : > { %v651_v22 = vpack.c.bf16 %v408_v20, %v405_v13  ;;  %v409_v15 = vmax.f32 %v373_v43, %v381_v14  ;;  %v412_v24 = vmax.f32 %v374_v11, %v382_v21  ;;  %v307_v25 = vmul.f32 %v594_v44, %v855_v60 }
  0x35   : > { %v308_v26 = vmul.f32 %v595_v45, %v855_v60  ;;  %v315_v27 = vmul.f32 %v610_v46, %v855_v60  ;;  %v316_v30 = vmul.f32 %v611_v49, %v855_v60  ;;  %v323_v31 = vmul.f32 %v626_v50, %v855_v60 }
  0x36   : > { %652 = vst [vmem:[%s909_s5] sm:$0xff] %v651_v22   ;;  %v410_v32 = vmax.f32 %v409_v15, %v389_v16  ;;  %v413_v33 = vmax.f32 %v412_v24, %v390_v17  ;;  %v324_v28 = vmul.f32 %v627_v51, %v855_v60  ;;  %v331_v44 = vmul.f32 %v642_v55, %v855_v60 }
  0x37   : > { %v332_v29 = vmul.f32 %v643_v56, %v855_v60  ;;  %v343_v45 = vadd.f32 %v872_v12, %v307_v25  ;;  %v344_v46 = vadd.f32 %v872_v12, %v308_v26  ;;  %v351_v49 = vadd.f32 %v872_v12, %v315_v27 }
  0x38   : > { %v411_v50 = vmax.f32 %v410_v32, %v397_v18  ;;  %v414_v34 = vmax.f32 %v413_v33, %v398_v19  ;;  %v352_v36 = vadd.f32 %v872_v12, %v316_v30  ;;  %v359_v51 = vadd.f32 %v872_v12, %v323_v31 }
  0x39   : > { %v360_v35 = vadd.f32 %v872_v12, %v324_v28  ;;  %v367_v55 = vadd.f32 %v872_v12, %v331_v44  ;;  %v368_v41 = vadd.f32 %v872_v12, %v332_v29  ;;  %v375_v56 = vmax.f32 %v343_v45, 0.0 }
  0x3a   : > { %v656_v37 = vpack.c.bf16 %v414_v34, %v411_v50  ;;  %v376_v38 = vmax.f32 %v344_v46, 0.0  ;;  %v383_v39 = vmax.f32 %v351_v49, 0.0  ;;  %v384_v48 = vmax.f32 %v352_v36, 0.0 }
  0x3b   : > { %v391_v54 = vmax.f32 %v359_v51, 0.0  ;;  %v392_v59 = vmax.f32 %v360_v35, 0.0  ;;  %v399_v4 = vmax.f32 %v367_v55, 0.0  ;;  %v400_v5 = vmax.f32 %v368_v41, 0.0 }
  0x3c   : > { %683 = vst [vmem:[%s909_s5 + $0x8] sm:$0xff] %v656_v37   ;;  %v415_v3 = vmax.f32 %v375_v56, %v383_v39  ;;  %v418_v6 = vmax.f32 %v376_v38, %v384_v48  ;;  %v309_v7 = vmul.f32 %v598_v57, %v855_v60  ;;  %v310_v8 = vmul.f32 %v599_v58, %v855_v60 }
  0x3d   : > { %v317_v9 = vmul.f32 %v614_v61, %v855_v60  ;;  %v318_v10 = vmul.f32 %v615_v62, %v855_v60  ;;  %v325_v23 = vmul.f32 %v630_v63, %v855_v60  ;;  %v326_v57 = vmul.f32 %v631_v0, %v855_v60 }
  0x3e   : > { %v416_v40 = vmax.f32 %v415_v3, %v391_v54  ;;  %v419_v43 = vmax.f32 %v418_v6, %v392_v59  ;;  %v333_v42 = vmul.f32 %v646_v1, %v855_v60  ;;  %v334_v58 = vmul.f32 %v647_v2, %v855_v60 }
  0x3f   : > { %v345_v47 = vadd.f32 %v872_v12, %v309_v7  ;;  %v346_v61 = vadd.f32 %v872_v12, %v310_v8  ;;  %v353_v62 = vadd.f32 %v872_v12, %v317_v9  ;;  %v354_v52 = vadd.f32 %v872_v12, %v318_v10 }
  0x40   : > { %v417_v63 = vmax.f32 %v416_v40, %v399_v4  ;;  %v420_v0 = vmax.f32 %v419_v43, %v400_v5  ;;  %v361_v11 = vadd.f32 %v872_v12, %v325_v23  ;;  %v362_v13 = vadd.f32 %v872_v12, %v326_v57 }
  0x41   : > { %v369_v1 = vadd.f32 %v872_v12, %v333_v42  ;;  %v370_v53 = vadd.f32 %v872_v12, %v334_v58  ;;  %v377_v60 = vmax.f32 %v345_v47, 0.0  ;;  %v378_v2 = vmax.f32 %v346_v61, 0.0 }
  0x42   : > { %v661_v20 = vpack.c.bf16 %v420_v0, %v417_v63  ;;  %v385_v14 = vmax.f32 %v353_v62, 0.0  ;;  %v386_v21 = vmax.f32 %v354_v52, 0.0  ;;  %v393_v16 = vmax.f32 %v361_v11, 0.0 }
  0x43   : > { %v394_v17 = vmax.f32 %v362_v13, 0.0  ;;  %v401_v18 = vmax.f32 %v369_v1, 0.0  ;;  %v402_v19 = vmax.f32 %v370_v53, 0.0 }
  0x44   : > { %684 = vst [vmem:[%s909_s5 + $0x10] sm:$0xff] %v661_v20   ;;  %v421_v22 = vmax.f32 %v377_v60, %v385_v14  ;;  %v424_v15 = vmax.f32 %v378_v2, %v386_v21 }
  0x46   : > { %v422_v24 = vmax.f32 %v421_v22, %v393_v16  ;;  %v425_v25 = vmax.f32 %v424_v15, %v394_v17 }
  0x48   : > { %v423_v26 = vmax.f32 %v422_v24, %v401_v18  ;;  %v426_v27 = vmax.f32 %v425_v25, %v402_v19 }
  0x4a   : > { %v666_v30 = vpack.c.bf16 %v426_v27, %v423_v26 }
  0x4c   : > { %685 = vst [vmem:[%s909_s5 + $0x18] sm:$0xff] %v666_v30  }
  0x4d PF: > { %s13_s14 = sadd.s32 1, %s734_s14   ;;  %s992_s12 = smov %s730_s13 }
  0x4e   : > { %p10_p6 = scmp.ge.s32.totalorder %s13_s14, 4   ;;  %s993_s13 = smov %s995_s15 }
  0x50   :  { %12 = sbr.rel (!%p10_p6) target bundleno = 2 (0x2), region = 62 }

// kernel: cnn_encoder_forward.6
= control target key start
LH: loop header
LB: loop body
LE: loop exit
PB: predicated region body
PF: predicated region fallthrough
CT: control target
= control target key end

     0   :  { %s950_s12 = smov 0   ;;  %s1057_s0 = inlined_call_operand.vmem [shape: bf16[128,288], index: 0, kind: input, shape index: {}]   ;;  %s1058_s1 = inlined_call_operand.vmem [shape: bf16[288,128], index: 1, kind: input, shape index: {}]   ;;  %s1059_s2 = inlined_call_operand.vmem [shape: bf16[128,128], index: 2, kind: output, shape index: {0}]   ;;  %s1060_s3 = inlined_call_operand.vmem [shape: f32[16,128], index: 3, kind: output, shape index: {1}]  }
   0x1 LB: > { %s956_s13 = sadd.s32 4294967295, %s928_s12   ;;  %p724_p0 = scmp.ge.s32.totalorder %s928_s12, 1  ;;  %s928_s12 = sphi %s950_s12, %s14_s12  }
   0x2   : > { %p142_p1 = scmp.lt.s32.totalorder %s928_s12, 3 }
   0x4   : > { %p143_p2 = pnand %p724_p0, %p142_p1 }
   0x5   : > { %v888_v0 = vld [vmem:[%s1058_s1 + $0x40] sm:$0xff] (!%p143_p2)   ;;  %s725_s16 = sshll.u32 (!%p143_p2), %s956_s13, 3  ;;  %v890_v2 = vld [vmem:[%s1058_s1 + $0x48] sm:$0xff] (!%p143_p2)   ;;  %v892_v4 = vld [vmem:[%s1058_s1 + $0x50] sm:$0xff] (!%p143_p2)   ;;  %vm409_vm0 = vcmask (!%p143_p2), 261120   ;;  %p184_p4 = scmp.lt.s32.totalorder (!%p143_p2), %s956_s13, 1 }
   0x6   : > { %146 = sbr.rel (%p143_p2) target bundleno = 296 (0x128), region = 28  ;;  %v889_v1 = vld [vmem:[%s1058_s1] sm:$0xff] (!%p143_p2)   ;;  %805 = vmatprep.subr.bf16.mxu0 (!%p143_p2), %v888_v0  ;;  %863 = vmatprep.subr.bf16.mxu1 (!%p143_p2), %v888_v0  ;;  %p172_p3 = scmp.lt.s32.totalorder (!%p143_p2), %s725_s16, 15  ;;  %v891_v3 = vld [vmem:[%s1058_s1 + $0x8] sm:$0xff] (!%p143_p2)   ;;  %v893_v5 = vld [vmem:[%s1058_s1 + $0x10] sm:$0xff] (!%p143_p2)  }
   0x7   : > { %806 = vmatpush3.bf16.msra.mxu0 (!%p143_p2), %v889_v1  ;;  %871 = vmatpush3.bf16.msra.mxu1 (!%p143_p2), %v889_v1  ;;  %v894_v6 = vld [vmem:[%s1058_s1 + $0x58] sm:$0xff] (!%p143_p2)   ;;  %v896_v8 = vld [vmem:[%s1058_s1 + $0x60] sm:$0xff] (!%p143_p2)   ;;  %v898_v10 = vld [vmem:[%s1058_s1 + $0x68] sm:$0xff] (!%p143_p2)  }
   0x8   : > { %807 = vmatprep.subr.bf16.mxu0 (!%p143_p2), %v890_v2  ;;  %864 = vmatprep.subr.bf16.mxu1 (!%p143_p2), %v890_v2  ;;  %v895_v7 = vld [vmem:[%s1058_s1 + $0x18] sm:$0xff] (!%p143_p2)   ;;  %v897_v9 = vld [vmem:[%s1058_s1 + $0x20] sm:$0xff] (!%p143_p2)   ;;  %v899_v13 = vld [vmem:[%s1058_s1 + $0x28] sm:$0xff] (!%p143_p2)  }
   0x9   : > { %v900_v14 = vld [vmem:[%s1058_s1 + $0x70] sm:$0xff] (!%p143_p2)   ;;  %v902_v16 = vld [vmem:[%s1058_s1 + $0x78] sm:$0xff] (!%p143_p2)   ;;  %v910_v18 = vld [vmem:[%s1058_s1 + $0x80] sm:$0xff] (!%p143_p2)  }
   0xa   : > { %v901_v15 = vld [vmem:[%s1058_s1 + $0x30] sm:$0xff] (!%p143_p2)   ;;  %v903_v17 = vld [vmem:[%s1058_s1 + $0x38] sm:$0xff] (!%p143_p2)   ;;  %v911_v22 = vld [vmem:[%s1058_s1 + $0x88] sm:$0xff] (!%p143_p2)  }
   0xb   : > { %808 = vmatpush3.bf16.msra.mxu0 (!%p143_p2), %v891_v3  ;;  %872 = vmatpush3.bf16.msra.mxu1 (!%p143_p2), %v891_v3 }
   0xc   : > { %809 = vmatprep.subr.bf16.mxu0 (!%p143_p2), %v892_v4  ;;  %865 = vmatprep.subr.bf16.mxu1 (!%p143_p2), %v892_v4 }
   0xd   : > { %s1062_s16 = smov (!%p172_p3, %s725_s16), 15  ;;  %s1064_s13 = smov (!%p184_p4, %s956_s13), 1 }
   0xe   : > { %s879_s29 = smul.u32 12, %s1062_s16  ;;  %s728_s4 = sshll.u32 %s1062_s16, 2 }
   0xf   : > { %810 = vmatpush3.bf16.msra.mxu0 %v893_v5  ;;  %873 = vmatpush3.bf16.msra.mxu1 %v893_v5  ;;  %s1043_s7 = scalar_lea.vmem %s1059_s2, %s728_s4  ;;  %s729_s16 = sshll.u32 %s1064_s13, 3 }
  0x10   : > { %811 = vmatprep.subr.bf16.mxu0 %v894_v6  ;;  %866 = vmatprep.subr.bf16.mxu1 %v894_v6  ;;  %s994_s9 = scalar_lea.vmem %s1057_s0, %s879_s29  ;;  %s187_s10 = scalar_lea.vmem %s1060_s3, %s729_s16 }
  0x11   : > { %v906_v11 = vld [vmem:[%s994_s9 + $0x4] ss:$12 sps:$4 sm:$0xff]   ;;  %v909_v12 = vld [vmem:[%s994_s9 + $0x4c] ss:$12 sps:$4 sm:$0xff]   ;;  %v907_v20 = vld [vmem:[%s994_s9 + $0x48] ss:$12 sps:$4 sm:$0xff]  }
  0x12   : > { %454 = vmatprep.mubr.bf16.mxu0 %v906_v11  ;;  %478 = vmatprep.mubr.bf16.mxu1 %v909_v12  ;;  %v904_v19 = vld [vmem:[%s994_s9] ss:$12 sps:$4 sm:$0xff]   ;;  %v912_v21 = vld [vmem:[%s994_s9 + $0x1c] ss:$12 sps:$4 sm:$0xff]   ;;  %v915_v24 = vld [vmem:[%s994_s9 + $0x18] ss:$12 sps:$4 sm:$0xff]  }
  0x13   : > { %812 = vmatpush3.bf16.msra.mxu0 %v895_v7  ;;  %874 = vmatpush3.bf16.msra.mxu1 %v895_v7  ;;  %v914_v23 = vld [vmem:[%s994_s9 + $0x8] ss:$12 sps:$4 sm:$0xff]   ;;  %v916_v25 = vld [vmem:[%s994_s9 + $0x20] ss:$12 sps:$4 sm:$0xff]   ;;  %v919_v27 = vld [vmem:[%s994_s9 + $0x38] ss:$12 sps:$4 sm:$0xff]  }
  0x14   : > { %813 = vmatprep.subr.bf16.mxu0 %v896_v8  ;;  %867 = vmatprep.subr.bf16.mxu1 %v896_v8  ;;  %v917_v26 = vld [vmem:[%s994_s9 + $0x34] ss:$12 sps:$4 sm:$0xff]   ;;  %v920_v28 = vld [vmem:[%s994_s9 + $0x30] ss:$12 sps:$4 sm:$0xff]  }
  0x15   : > { %v921_v29 = vld [vmem:[%s994_s9 + $0x50] ss:$12 sps:$4 sm:$0xff]  }
  0x17   : > { %814 = vmatpush3.bf16.msra.mxu0 %v897_v9  ;;  %875 = vmatpush3.bf16.msra.mxu1 %v897_v9 }
  0x18   : > { %815 = vmatprep.subr.bf16.mxu0 %v898_v10  ;;  %868 = vmatprep.subr.bf16.mxu1 %v898_v10 }
  0x1b   : > { %816 = vmatpush3.bf16.msra.mxu0 %v899_v13  ;;  %876 = vmatpush3.bf16.msra.mxu1 %v899_v13 }
  0x1c   : > { %817 = vmatprep.subr.bf16.mxu0 %v900_v14  ;;  %869 = vmatprep.subr.bf16.mxu1 %v900_v14 }
  0x1f   : > { %818 = vmatpush3.bf16.msra.mxu0 %v901_v15  ;;  %877 = vmatpush3.bf16.msra.mxu1 %v901_v15 }
  0x20   : > { %819 = vmatprep.subr.bf16.mxu0 %v902_v16  ;;  %870 = vmatprep.subr.bf16.mxu1 %v902_v16 }
  0x23   : > { %820 = vmatpush3.bf16.msra.mxu0 %v903_v17  ;;  %878 = vmatpush3.bf16.msra.mxu1 %v903_v17 }
  0x24   : > { %851 = vmatprep.subr.bf16.mxu1 %v910_v18 }
  0x26   : > { %455 = vmatmul.mubr.bf16.vlgmr.msra.gmra.mrb[0].mxu0 %v904_v19  ;;  %479 = vmatmul.mubr.bf16.vlgmr.msra.gmra.mrb[0].mxu1 %v907_v20 }
  0x27   : > { %852 = vmatpush3.bf16.msra.mxu1 %v910_v18  ;;  %462 = vmatprep.mubr.bf16.mxu0 %v912_v21 }
  0x28   : > { %853 = vmatprep.subr.bf16.mxu1 %v911_v22  ;;  %855 = vmatprep.mubr.msk.bf16.mxu1 %vm409_vm0, %v914_v23 }
  0x2b   : > { %854 = vmatpush3.bf16.msra.mxu1 %v911_v22 }
  0x2e   : > { %463 = vmatmul.mubr.bf16.gmra.mrb[4].mxu0 %v915_v24  ;;  %856 = vmatmul.mubr.msk.bf16.vlgmr.msra.gmra.mrb[4].mxu1 %vm409_vm0, %v916_v25 }
  0x2f   : > { %470 = vmatprep.mubr.bf16.mxu0 %v917_v26  ;;  %859 = vmatprep.mubr.msk.bf16.mxu1 %vm409_vm0, %v919_v27 }
  0x36   : > { %471 = vmatmul.mubr.bf16.gmra.mrb[8].mxu0 %v920_v28  ;;  %860 = vmatmul.mubr.msk.bf16.gmra.mrb[8].mxu1 %vm409_vm0, %v921_v29 }
  0xf9   : > { %v821_v30 = vpop.f32.mrb[0].mxu0  ;;  %v839_v31 = vpop.f32.mrb[0].mxu1 }
  0xfa   : > { %v822_v32 = vpop.f32.mrb[1].mxu0  ;;  %v840_v33 = vpop.f32.mrb[1].mxu1 }
  0xfb   : > { %v823_v34 = vadd.f32 %v822_v32, %v821_v30  ;;  %v841_v35 = vadd.f32 %v840_v33, %v839_v31  ;;  %v824_v36 = vpop.f32.mrb[2].mxu0  ;;  %v842_v37 = vpop.f32.mrb[2].mxu1 }
  0xfc   : > { %v825_v38 = vpop.f32.mrb[3].mxu0  ;;  %v843_v39 = vpop.f32.mrb[3].mxu1 }
  0xfd   : > { %v826_v40 = vadd.f32 %v825_v38, %v824_v36  ;;  %v844_v41 = vadd.f32 %v843_v39, %v842_v37 }
 0x101   : > { %v827_v42 = vpop.f32.mrb[4].mxu0  ;;  %v857_v43 = vpop.f32.mrb[4].mxu1 }
 0x102   : > { %v828_v44 = vpop.f32.mrb[5].mxu0  ;;  %v521_v45 = vpop.f32.mrb[5].mxu1 }
 0x103   : > { %v829_v46 = vadd.f32 %v828_v44, %v827_v42  ;;  %v522_v47 = vadd.f32 %v823_v34, %v521_v45  ;;  %v830_v48 = vpop.f32.mrb[6].mxu0  ;;  %v858_v49 = vpop.f32.mrb[6].mxu1 }
 0x104   : > { %v831_v50 = vpop.f32.mrb[7].mxu0  ;;  %v524_v51 = vpop.f32.mrb[7].mxu1 }
 0x105   : > { %v530_v52 = vadd.f32 %v857_v43, %v829_v46  ;;  %v832_v53 = vadd.f32 %v831_v50, %v830_v48  ;;  %v525_v54 = vadd.f32 %v826_v40, %v524_v51  ;;  %v605_v58 = vmul.f32 %v522_v47, %v522_v47 }
 0x107   : > { %v533_v55 = vadd.f32 %v858_v49, %v832_v53  ;;  %v785_v56 = vpack.c.bf16 %v525_v54, %v522_v47  ;;  %v592_v57 = vadd.f32 %v525_v54, %v522_v47  ;;  %v606_v59 = vmul.f32 %v525_v54, %v525_v54 }
 0x108   : > { %v607_v0 = vmul.f32 %v530_v52, %v530_v52 }
 0x109   : > { %v790_v60 = vpack.c.bf16 %v533_v55, %v530_v52  ;;  %786 = vst [vmem:[%s1043_s7] sm:$0xff] %v785_v56   ;;  %v593_v61 = vadd.f32 %v592_v57, %v530_v52  ;;  %v833_v62 = vpop.f32.mrb[8].mxu0  ;;  %v861_v63 = vpop.f32.mrb[8].mxu1  ;;  %v613_v1 = vadd.f32 %v606_v59, %v605_v58  ;;  %v608_v9 = vmul.f32 %v533_v55, %v533_v55 }
 0x10a   : > { %v546_v2 = vadd.f32 %v861_v63, %v841_v35  ;;  %v834_v3 = vpop.f32.mrb[9].mxu0  ;;  %v537_v4 = vpop.f32.mrb[9].mxu1  ;;  %v626_v35 = vlaneseq }
 0x10b   : > { %802 = vst [vmem:[%s1043_s7 + $0x8] sm:$0xff] %v790_v60   ;;  %v835_v5 = vadd.f32 %v834_v3, %v833_v62  ;;  %v594_v6 = vadd.f32 %v593_v61, %v533_v55  ;;  %v836_v7 = vpop.f32.mrb[10].mxu0  ;;  %v862_v8 = vpop.f32.mrb[10].mxu1  ;;  %v614_v10 = vadd.f32 %v613_v1, %v607_v0 }
 0x10c   : > { %v549_v11 = vadd.f32 %v862_v8, %v844_v41  ;;  %v837_v12 = vpop.f32.mrb[11].mxu0  ;;  %v540_v13 = vpop.f32.mrb[11].mxu1  ;;  %v611_v25 = vmul.f32 %v546_v2, %v546_v2  ;;  %v627_v40 = vshrl.u32 %v626_v35, 7 }
 0x10d   : > { %v538_v14 = vadd.f32 %v835_v5, %v537_v4  ;;  %v838_v15 = vadd.f32 %v837_v12, %v836_v7  ;;  %v615_v16 = vadd.f32 %v614_v10, %v608_v9 }
 0x10e   : > { %v800_v17 = vpack.c.bf16 %v549_v11, %v546_v2  ;;  %v612_v28 = vmul.f32 %v549_v11, %v549_v11  ;;  %vm629_vm1 = vcmp.eq.s32.totalorder %v627_v40, 1  ;;  %vm628_vm2 = vcmp.eq.s32.totalorder %v627_v40, 0 }
 0x10f   : > { %v595_v18 = vadd.f32 %v594_v6, %v538_v14  ;;  %v609_v19 = vmul.f32 %v538_v14, %v538_v14  ;;  %v541_v20 = vadd.f32 %v838_v15, %v540_v13 }
 0x110   : > { %804 = vst [vmem:[%s1043_s7 + $0x18] sm:$0xff] %v800_v17  }
 0x111   : > { %v616_v21 = vadd.f32 %v615_v16, %v609_v19  ;;  %v795_v22 = vpack.c.bf16 %v541_v20, %v538_v14  ;;  %v596_v23 = vadd.f32 %v595_v18, %v541_v20  ;;  %v610_v24 = vmul.f32 %v541_v20, %v541_v20 }
 0x113   : > { %803 = vst [vmem:[%s1043_s7 + $0x10] sm:$0xff] %v795_v22   ;;  %v597_v26 = vadd.f32 %v596_v23, %v546_v2  ;;  %v617_v27 = vadd.f32 %v616_v21, %v610_v24 }
 0x115   : > { %v598_v29 = vadd.f32 %v597_v26, %v549_v11  ;;  %v618_v30 = vadd.f32 %v617_v27, %v611_v25 }
 0x117   : > { %v599_v31 = vrot.slane %v598_v29, 4  ;;  %v619_v32 = vadd.f32 %v618_v30, %v612_v28 }
 0x119   : > { %v600_v33 = vadd.f32 %v599_v31, %v598_v29  ;;  %v620_v34 = vrot.slane %v619_v32, 4 }
 0x11b   : > { %v601_v36 = vrot.slane %v600_v33, 2  ;;  %v621_v37 = vadd.f32 %v620_v34, %v619_v32 }
 0x11d   : > { %v602_v38 = vadd.f32 %v601_v36, %v600_v33  ;;  %v622_v39 = vrot.slane %v621_v37, 2 }
 0x11f   : > { %v623_v41 = vadd.f32 %v622_v39, %v621_v37  ;;  %v603_v42 = vrot.slane %v602_v38, 1 }
 0x121   : > { %v624_v43 = vrot.slane %v623_v41, 1  ;;  %v604_v45 = vadd.f32 %v603_v42, %v602_v38 }
 0x123   : > { %v625_v44 = vadd.f32 %v624_v43, %v623_v41 }
 0x125   : > { %v630_v46 = vsel %vm629_vm1, %v625_v44, 0.0 }
 0x126   : > { %v631_v47 = vsel %vm628_vm2, %v604_v45, %v630_v46 }
 0x127   : > { %632 = vst [vmem:[%s187_s10] sm:$0xff] %v631_v47 }
 0x128 PF: > { %s14_s12 = sadd.s32 1, %s928_s12  }
 0x129   : > { %p11_p5 = scmp.ge.s32.totalorder %s14_s12, 4  }
 0x12b   :  { %13 = sbr.rel (!%p11_p5) target bundleno = 1 (0x1), region = 70 }

// kernel: cnn_encoder_forward.7
= control target key start
LH: loop header
LB: loop body
LE: loop exit
PB: predicated region body
PF: predicated region fallthrough
CT: control target
= control target key end

     0   :  { %s481_s12 = smov 0   ;;  %s483_s13 = smov 0   ;;  %s531_s0 = inlined_call_operand.vmem [shape: bf16[8,16,128], index: 0, kind: input, shape index: {}]   ;;  %s532_s1 = inlined_call_operand.vmem [shape: f32[16,128], index: 1, kind: input, shape index: {}]   ;;  %s533_s2 = inlined_call_operand.vmem [shape: f32[8,128], index: 2, kind: input, shape index: {}]   ;;  %s534_s3 = inlined_call_operand.vmem [shape: f32[2,16,128], index: 3, kind: output, shape index: {}]  }
   0x1   :  { %s485_s14 = smov 0  }
   0x2 LB: > { %s25_s15 = sadd.s32 1, %s455_s13  ;;  %p382_p0 = scmp.ge.s32.totalorder %s459_s14, 1  ;;  %s459_s14 = sphi %s485_s14, %s13_s14   ;;  %s455_s13 = sphi %s483_s13, %s536_s13   ;;  %s451_s12 = sphi %s481_s12, %s535_s12  }
   0x3   : > { %p27_p1 = scmp.ge.s32.totalorder %s25_s15, 2  ;;  %p160_p2 = scmp.lt.s32.totalorder %s459_s14, 3 }
   0x5   : > { %s538_s15 = smov (%p27_p1, %s25_s15), 0  ;;  %p161_p3 = pnand %p382_p0, %p160_p2 }
   0x6   : > { %v215_v0 = vld [vmem:[%s532_s1] sm:$0xff] (!%p161_p3)  ;;  %v216_v1 = vld [vmem:[%s532_s1 + $0x8] sm:$0xff] (!%p161_p3)  ;;  %s383_s20 = sshll.u32 (!%p161_p3), %s451_s12, 2  ;;  %v251_v9 = vlaneseq (!%p161_p3)  ;;  %p206_p5 = scmp.lt.s32.totalorder (!%p161_p3), %s451_s12, 1 }
   0x7   : > { %164 = sbr.rel (%p161_p3) target bundleno = 52 (0x34), region = 32  ;;  %v217_v2 = vadd.f32 (!%p161_p3), %v216_v1, %v215_v0  ;;  %p195_p4 = scmp.lt.s32.totalorder (!%p161_p3), %s383_s20, 7  ;;  %v227_v11 = vld [vmem:[%s533_s2] sm:$0x1] (!%p161_p3)  ;;  %v232_v23 = vld [vmem:[%s533_s2 + $0x1] sm:$0x1] (!%p161_p3) }
   0x8   : > { %v252_v10 = vshrl.u32 (!%p161_p3), %v251_v9, 7 }
   0x9   : > { %v218_v3 = vmul.f32 (!%p161_p3), 0.0078125, %v217_v2 }
   0xa   : > { %v253_v18 = vsub.s32 (!%p161_p3), 0, %v252_v10 }
   0xb   : > { %v219_v4 = vmul.f32 (!%p161_p3), %v218_v3, %v218_v3 }
   0xd   : > { %v221_v5 = vrot.slane (!%p161_p3), %v219_v4, 7 }
   0xe   : > { %s540_s20 = smov (!%p195_p4, %s383_s20), 7  ;;  %s542_s12 = smov (!%p206_p5, %s451_s12), 1 }
   0xf   : > { %v223_v6 = vsub.f32 %v218_v3, %v221_v5  ;;  %s390_s21 = sshll.u32 %s540_s20, 3  ;;  %s391_s29 = sshll.u32 %s542_s12, 4 }
  0x10   : > { %s202_s24 = scalar_lea.vmem %s531_s0, %s390_s21  ;;  %s213_s5 = scalar_lea.vmem %s534_s3, %s391_s29 }
  0x11   : > { %v224_v7 = vmax.f32 %v223_v6, 0.0  ;;  %v393_v13 = vld [vmem:[%s202_s24] sm:$0xff]   ;;  %v408_v14 = vld [vmem:[%s202_s24 + $0x8] sm:$0xff]   ;;  %v409_v15 = vld [vmem:[%s202_s24 + $0x10] sm:$0xff]  }
  0x12   : > { %v410_v17 = vld [vmem:[%s202_s24 + $0x18] sm:$0xff]   ;;  %v394_v20 = vunpack.c.l.bf16 %v393_v13  ;;  %v398_v21 = vunpack.c.l.bf16 %v408_v14  ;;  %v402_v22 = vunpack.c.l.bf16 %v409_v15  ;;  %v395_v25 = vunpack.c.h.bf16 %v393_v13 }
  0x13   : > { %v225_v8 = vadd.f32 1e-05, %v224_v7  ;;  %v406_v24 = vunpack.c.l.bf16 %v410_v17  ;;  %v399_v26 = vunpack.c.h.bf16 %v408_v14  ;;  %v403_v27 = vunpack.c.h.bf16 %v409_v15 }
  0x14   : > { %v407_v30 = vunpack.c.h.bf16 %v410_v17 }
  0x15   : > { %435 = vrsqrt.f32 %v225_v8 }
  0x1f   : > { %v436_v12 = vpop.eup %435 }
  0x20   : > { %v229_v16 = vrot.slane %v436_v12, 1 }
  0x22   : > { %v231_v19 = vmul.f32 %v229_v16, %v227_v11 }
  0x24   : > { %v233_v28 = vmul.f32 %v231_v19, %v218_v3  ;;  %v254_v29 = vrot.slane %v231_v19, %v253_v18 }
  0x26   : > { %v234_v31 = vsub.f32 %v232_v23, %v233_v28  ;;  %v255_v32 = vmul.f32 %v394_v20, %v254_v29  ;;  %v257_v33 = vmul.f32 %v398_v21, %v254_v29  ;;  %v259_v34 = vmul.f32 %v402_v22, %v254_v29 }
  0x27   : > { %v261_v35 = vmul.f32 %v406_v24, %v254_v29  ;;  %v256_v36 = vmul.f32 %v395_v25, %v254_v29  ;;  %v258_v37 = vmul.f32 %v399_v26, %v254_v29  ;;  %v260_v38 = vmul.f32 %v403_v27, %v254_v29 }
  0x28   : > { %v266_v39 = vrot.slane %v234_v31, %v253_v18  ;;  %v262_v40 = vmul.f32 %v407_v30, %v254_v29 }
  0x2a   : > { %v267_v41 = vadd.f32 %v266_v39, %v255_v32  ;;  %v269_v42 = vadd.f32 %v266_v39, %v257_v33  ;;  %v271_v43 = vadd.f32 %v266_v39, %v259_v34  ;;  %v273_v44 = vadd.f32 %v266_v39, %v261_v35 }
  0x2b   : > { %v268_v45 = vadd.f32 %v266_v39, %v256_v36  ;;  %v270_v46 = vadd.f32 %v266_v39, %v258_v37  ;;  %v272_v47 = vadd.f32 %v266_v39, %v260_v38  ;;  %v274_v48 = vadd.f32 %v266_v39, %v262_v40 }
  0x2c   : > { %v275_v49 = vmax.f32 %v267_v41, 0.0  ;;  %v277_v50 = vmax.f32 %v269_v42, 0.0  ;;  %v279_v51 = vmax.f32 %v271_v43, 0.0  ;;  %v281_v52 = vmax.f32 %v273_v44, 0.0 }
  0x2d   : > { %v276_v53 = vmax.f32 %v268_v45, 0.0  ;;  %v278_v54 = vmax.f32 %v270_v46, 0.0  ;;  %v280_v55 = vmax.f32 %v272_v47, 0.0  ;;  %v282_v56 = vmax.f32 %v274_v48, 0.0 }
  0x2e   : > { %v283_v57 = vmax.f32 %v275_v49, %v279_v51  ;;  %v284_v58 = vmax.f32 %v277_v50, %v281_v52 }
  0x2f   : > { %v286_v59 = vmax.f32 %v276_v53, %v280_v55  ;;  %v287_v60 = vmax.f32 %v278_v54, %v282_v56 }
  0x30   : > { %v285_v61 = vmax.f32 %v283_v57, %v284_v58 }
  0x31   : > { %v288_v62 = vmax.f32 %v286_v59, %v287_v60 }
  0x32   : > { %289 = vst [vmem:[%s213_s5] sm:$0xff] %v285_v61 }
  0x33   : > { %290 = vst [vmem:[%s213_s5 + $0x8] sm:$0xff] %v288_v62 }
  0x34 PF: > { %s13_s14 = sadd.s32 1, %s459_s14   ;;  %s535_s12 = smov %s455_s13 }
  0x35   : > { %p10_p6 = scmp.ge.s32.totalorder %s13_s14, 4   ;;  %s536_s13 = smov %s538_s15 }
  0x37   :  { %12 = sbr.rel (!%p10_p6) target bundleno = 2 (0x2), region = 62 }

</bundles_post_ra>
